<compile_context>
chip_gen: v7x
topology: tpu7x:2x2x1
jax: 0.10.0
libtpu: 0.0.40
codegen_flags: <defaults>
</compile_context>

<pallas_src>
import functools
import math

import jax
import jax.numpy as jnp
from jax.experimental import pallas as pl
from jax.experimental.pallas import tpu as pltpu


def _round_up(x, m):
    return (x + m - 1) // m * m


def _cdiv(a, b):
    return -(-a // b)


def _cnn_encoder_kernel(x_ref, w_ref, b_ref, o_ref, cols_ref, acc_ref, *,
                        tc, n_chunks, k_max, gsz, group_lo):
    """One batch tile: all-heights conv -> masked global max-pool -> +bias -> ReLU.

    x_ref   : (TB, L_pad, D_aug)    input tile; lane D is a 1.0 indicator on
                                    end-padding rows (0 elsewhere).
    w_ref   : (k_max*D_aug, HC_pad) packed conv weights, tap-major; each tap's
                                    indicator row holds -1e30 for the heads that
                                    use the tap (kills partial windows).
    b_ref   : (1, HC_pad)           conv bias (applied after pooling).
    o_ref   : (TB, HC_pad)          pooled encodings (lane dense).
    cols_ref: (TB*tc, gsz*D_aug)    scratch: im2col block of one tap group.
    acc_ref : scratch f32 pre-pool accumulator (only used when n_groups > 1).
    """
    TB = x_ref.shape[0]
    d_aug = x_ref.shape[2]
    HC_pad = o_ref.shape[1]
    M = TB * tc
    n_groups = len(group_lo)

    def slab(start):
        # (TB, tc, d_aug) shifted window -> (TB*tc, d_aug); tc is a multiple of
        # the sublane tile so the reshape is layout-free.
        return x_ref[:, pl.ds(start, tc), :].reshape(M, d_aug)

    def chunk_max(ci):
        """Conv for positions [ci*tc, (ci+1)*tc), max-pooled over the chunk."""
        t0 = ci * tc
        if not isinstance(t0, int):
            t0 = pl.multiple_of(t0, tc)
        vals = None
        for g in range(n_groups):              # static: tap groups, K ~ MXU depth
            j0 = g * gsz
            taps = min(gsz, k_max - j0)
            lo = group_lo[g]                    # static, 128-aligned column suffix
            for jj in range(taps):              # assemble the group's im2col block
                cols_ref[:, jj * d_aug:(jj + 1) * d_aug] = slab(t0 + j0 + jj)
            kg = taps * d_aug
            part = jnp.dot(cols_ref[:, :kg],
                           w_ref[j0 * d_aug:j0 * d_aug + kg, lo:],
                           preferred_element_type=jnp.float32)
            if n_groups == 1:
                vals = part
            elif g == 0:                        # group 0 always spans all columns
                acc_ref[...] = part
            else:                               # later taps: only the heads that
                acc_ref[:, lo:] += part         # use them (suffix, lane aligned)
        if n_groups > 1:
            vals = acc_ref[...]
        return jnp.max(vals.reshape(TB, tc, HC_pad), axis=1)

    if n_chunks == 1:
        rmax = chunk_max(0)
    else:
        rmax = jax.lax.fori_loop(
            0, n_chunks,
            lambda ci, m: jnp.maximum(m, chunk_max(ci)),
            jnp.full((TB, HC_pad), -jnp.inf, jnp.float32))

    # max(x + b) == max(x) + b and ReLU(max(x)) == max(ReLU(x)): bias and the
    # pre-pooling ReLU are applied once on the pooled (TB, HC_pad) tile.
    o_ref[...] = jnp.maximum(rmax + b_ref[...], 0.0).astype(o_ref.dtype)


def _resident_spec(shape):
    """Grid-invariant operand: constant index_map + a single VMEM buffer."""
    index_map = lambda i: (0,) * len(shape)
    try:
        return pl.BlockSpec(shape, index_map, pipeline_mode=pl.Buffered(1))
    except TypeError:  # older BlockSpec without pipeline_mode
        return pl.BlockSpec(shape, index_map)


def sequence_basic_cnn_encoder(x, weights, biases, kernel_heights,
                               compute_dtype=jnp.bfloat16):
    """Forward pass of SequenceBasicCNNEncoder with its default arguments
    (no input activation, ReLU before pooling, global max pool, no post-pooling
    activation, no dropout).

    x       : (B, L, D) float32
    weights : list of (k_h, D, C) conv weights, tap-major
              (== torch Conv1d weight.permute(2, 1, 0))
    biases  : list of (1, C) or (C,) conv biases
    returns : (B, len(kernel_heights) * C) float32
    """
    B, L, D = x.shape
    H = len(kernel_heights)
    C = int(weights[0].shape[-1])
    HC = H * C
    k_max = max(kernel_heights)
    k_min = min(kernel_heights)
    for h in range(H):
        assert weights[h].shape == (kernel_heights[h], D, C), weights[h].shape

    x = jnp.asarray(x, jnp.float32)
    # Module semantics: sequences shorter than the largest kernel are padded
    # with zeros at the *front* (pad_at_end=False).
    if k_max > L:
        x = jnp.pad(x, ((0, 0), (k_max - L, 0), (0, 0)))
        L = k_max

    # ---- static geometry ---------------------------------------------------
    D_aug = _round_up(D + 1, 16)      # +1 indicator lane; minimal sublane-tile pad
    HC_pad = _round_up(HC, 128)       # lane-dense output
    T_need = L - k_min + 1            # conv positions any head needs
    n_chunks = _cdiv(T_need, 256)     # chunk the position axis (tc ~ 128-256)
    tc = _round_up(_cdiv(T_need, n_chunks), 16)
    t_pad = tc * n_chunks
    L_pad = t_pad + k_max - 1

    gsz = max(1, min(k_max, 256 // D_aug))   # taps fused per matmul: K ~ MXU depth
    n_groups = _cdiv(k_max, gsz)
    k_cols = gsz * D_aug                     # lane width of one im2col tap group

    # Heads sorted by ascending kernel height so that "heads using tap j" is a
    # contiguous column suffix; the output is permuted back afterwards.
    order = sorted(range(H), key=lambda h: kernel_heights[h])
    heights_sorted = [kernel_heights[h] for h in order]

    def _first_col(tap):                     # first column of a head using `tap`
        for g, kh in enumerate(heights_sorted):
            if kh > tap:
                return (g * C) // 128 * 128  # round down -> lane aligned, safe
        return 0
    group_lo = tuple(_first_col(g * gsz) for g in range(n_groups))

    # ---- packed operands ----------------------------------------------------
    NEG = -1e30
    W = jnp.zeros((k_max * D_aug, HC_pad), jnp.float32)
    bias_row = jnp.zeros((1, HC_pad), jnp.float32)
    for g, h in enumerate(order):
        kh = kernel_heights[h]
        w = jnp.asarray(weights[h], jnp.float32)
        b = jnp.asarray(biases[h], jnp.float32).reshape(-1)
        c0 = g * C
        for j in range(kh):
            W = W.at[j * D_aug:j * D_aug + D, c0:c0 + C].set(w[j])
            W = W.at[j * D_aug + D, c0:c0 + C].set(NEG)  # indicator row: masks
        bias_row = bias_row.at[0, c0:c0 + C].set(b)      # partial / padded windows
    W = W.astype(compute_dtype)

    # x: real features + indicator lane that is 1.0 on end-padding rows.
    x_aug = jnp.zeros((B, L_pad, D_aug), jnp.float32)
    x_aug = x_aug.at[:, :L, :D].set(x)
    x_aug = x_aug.at[:, L:, D].set(1.0)
    x_aug = x_aug.astype(compute_dtype)

    # ---- batch tiling from the per-generation VMEM budget -------------------
    try:
        vmem_cap = int(pltpu.get_tpu_info().vmem_capacity_bytes)
    except Exception:
        vmem_cap = 64 * 1024 * 1024          # v7x per-TensorCore size (smallest)
    vmem_limit = vmem_cap * 3 // 4           # leave headroom for compiler scratch

    itemsize = jnp.dtype(compute_dtype).itemsize
    acc_rows = tc if n_groups > 1 else 1
    fixed = (k_max * D_aug * HC_pad * itemsize   # resident packed weights (1 buf)
             + 2 * HC_pad * 4 + (2 << 20))       # bias + slack
    per_row = (2 * L_pad * D_aug * itemsize      # x block (double buffered)
               + 2 * HC_pad * 4                  # out block (double buffered)
               + tc * k_cols * itemsize          # im2col scratch
               + (acc_rows + tc) * HC_pad * 4    # accumulator + matmul result
               + 2 * HC_pad * 4)                 # running / chunk max
    tb_cap = max(8, min(512, (vmem_limit - fixed) // per_row // 8 * 8))
    if B >= 2:
        # >= 2 parallel batch tiles: feeds both v7x TensorCores, gives the
        # pipeline >1 stage to overlap the x DMA with compute.
        TB = int(min(tb_cap, _round_up(_cdiv(B, 2), 8)))
        n_tiles = max(_cdiv(B, TB), 2)
    else:
        TB = int(min(tb_cap, 8))
        n_tiles = 1
    B_pad = n_tiles * TB
    if B_pad > B:
        x_aug = jnp.pad(x_aug, ((0, B_pad - B), (0, 0), (0, 0)))

    kernel = functools.partial(
        _cnn_encoder_kernel, tc=tc, n_chunks=n_chunks, k_max=k_max,
        gsz=gsz, group_lo=group_lo)
    acc_shape = (TB * tc, HC_pad) if n_groups > 1 else (8, 128)

    out = pl.pallas_call(
        kernel,
        out_shape=jax.ShapeDtypeStruct((B_pad, HC_pad), jnp.float32),
        grid_spec=pltpu.PrefetchScalarGridSpec(
            num_scalar_prefetch=0,
            grid=(n_tiles,),
            in_specs=[
                pl.BlockSpec((TB, L_pad, D_aug), lambda i: (i, 0, 0)),
                _resident_spec((k_max * D_aug, HC_pad)),
                _resident_spec((1, HC_pad)),
            ],
            out_specs=pl.BlockSpec((TB, HC_pad), lambda i: (i, 0)),
            scratch_shapes=[
                pltpu.VMEM((TB * tc, k_cols), compute_dtype),
                pltpu.VMEM(acc_shape, jnp.float32),
            ],
        ),
        compiler_params=pltpu.CompilerParams(
            dimension_semantics=("parallel",),
            vmem_limit_bytes=int(vmem_limit)),
    )(x_aug, W, bias_row)

    out = out[:B, :HC]
    if order != list(range(H)):     # restore the caller's kernel_heights order
        inv = {h: g for g, h in enumerate(order)}
        out = jnp.concatenate([out[:, inv[h] * C:(inv[h] + 1) * C]
                               for h in range(H)], axis=1)
    return out


def _reference_forward(x, weights, biases, kernel_heights):
    """Pure-JAX f32 reference of the module forward (default options)."""
    B, L, D = x.shape
    k_max = max(kernel_heights)
    if k_max > L:
        x = jnp.pad(x, ((0, 0), (k_max - L, 0), (0, 0)))
        L = k_max
    hi = jax.lax.Precision.HIGHEST
    outs = []
    for w, b, k in zip(weights, biases, kernel_heights):
        T = L - k + 1
        conv = sum(jnp.einsum("bld,dc->blc", x[:, j:j + T, :], w[j], precision=hi)
                   for j in range(k))
        conv = conv + jnp.asarray(b, jnp.float32).reshape(1, 1, -1)
        conv = jnp.maximum(conv, 0.0)
        outs.append(jnp.max(conv, axis=1))
    return jnp.concatenate(outs, axis=1) if len(outs) > 1 else outs[0]


if __name__ == "__main__":
    # Small shapes consistent with the module forward:
    # batch=2, seq_len=8, time_step_size=32, out_channels=128 per kernel height.
    B, L, D, C = 2, 8, 32, 128
    kernel_heights = (1, 2, 3, 4, 5)

    key = jax.random.PRNGKey(0)
    keys = jax.random.split(key, 4)
    x = jax.random.normal(keys[0], (B, L, D), jnp.float32)

    def make_params(heights, d, c, base):
        # nn.Conv1d-style init: uniform(+-1/sqrt(fan_in)), fan_in = d * k.
        ws, bs = [], []
        for i, k in enumerate(heights):
            bound = 1.0 / math.sqrt(d * k)
            ws.append(jax.random.uniform(jax.random.fold_in(base, 2 * i),
                                         (k, d, c), jnp.float32, -bound, bound))
            bs.append(jax.random.uniform(jax.random.fold_in(base, 2 * i + 1),
                                         (1, c), jnp.float32, -bound, bound))
        return ws, bs

    weights, biases = make_params(kernel_heights, D, C, keys[1])
    ref = _reference_forward(x, weights, biases, kernel_heights)

    # bf16 compute (MXU-native inputs, f32 accumulate).
    out_bf16 = jax.block_until_ready(
        sequence_basic_cnn_encoder(x, weights, biases, kernel_heights))
    assert out_bf16.shape == (B, len(kernel_heights) * C), out_bf16.shape
    assert jnp.allclose(out_bf16, ref, atol=3e-2, rtol=3e-2), \
        float(jnp.max(jnp.abs(out_bf16 - ref)))

    # f32 compute path, tighter tolerance.
    out_f32 = jax.block_until_ready(
        sequence_basic_cnn_encoder(x, weights, biases, kernel_heights,
                                   compute_dtype=jnp.float32))
    assert jnp.allclose(out_f32, ref, atol=2e-3, rtol=2e-3), \
        float(jnp.max(jnp.abs(out_f32 - ref)))

    # Short sequence (< max kernel height): module front-pads with zeros.
    x_short = jax.random.normal(keys[2], (B, 3, D), jnp.float32)
    ref_short = _reference_forward(x_short, weights, biases, kernel_heights)
    out_short = jax.block_until_ready(
        sequence_basic_cnn_encoder(x_short, weights, biases, kernel_heights))
    assert jnp.allclose(out_short, ref_short, atol=3e-2, rtol=3e-2), \
        float(jnp.max(jnp.abs(out_short - ref_short)))

    # Longer sequence with unsorted heights: exercises the chunked running max
    # (fori_loop), multi-tap-group suffix accumulation and the output
    # head-order-restoring permutation.
    heights2 = (2, 4, 3)
    B2, L2, D2, C2 = 2, 260, 160, 64
    x2 = jax.random.normal(keys[3], (B2, L2, D2), jnp.float32)
    weights2, biases2 = make_params(heights2, D2, C2, keys[1])
    ref2 = _reference_forward(x2, weights2, biases2, heights2)
    out2 = jax.block_until_ready(
        sequence_basic_cnn_encoder(x2, weights2, biases2, heights2,
                                   compute_dtype=jnp.float32))
    assert out2.shape == (B2, len(heights2) * C2), out2.shape
    assert jnp.allclose(out2, ref2, atol=2e-3, rtol=2e-3), \
        float(jnp.max(jnp.abs(out2 - ref2)))

    print("KERNEL_OK")
</pallas_src>

<mosaic_0001>
module attributes {stable_mosaic.version = 11 : i64} {
  func.func @_cnn_encoder_kernel(%arg0: i32, %arg1: memref<8x20x48xbf16, #tpu.memory_space<vmem>>, %arg2: memref<240x640xbf16, #tpu.memory_space<vmem>>, %arg3: memref<1x640xf32, #tpu.memory_space<vmem>>, %arg4: memref<8x640xf32, #tpu.memory_space<vmem>>, %arg5: memref<128x240xbf16, #tpu.memory_space<vmem>>, %arg6: memref<8x128xf32, #tpu.memory_space<vmem>>) attributes {dimension_semantics = [#tpu.dimension_semantics<parallel>], iteration_bounds = array<i64: 2>, scalar_prefetch = 0 : i64, scratch_operands = 2 : i64, tpu.core_type = #tpu.core_type<tc>, window_params = [{transform_indices = @transform_0, window_bounds = array<i64: 8, 20, 48>}, {pipeline_mode = #tpu.pipeline_mode<synchronous>, transform_indices = @transform_1, window_bounds = array<i64: 240, 640>}, {pipeline_mode = #tpu.pipeline_mode<synchronous>, transform_indices = @transform_2, window_bounds = array<i64: 1, 640>}, {transform_indices = @transform_3, window_bounds = array<i64: 8, 640>}]} {
    %c0 = arith.constant 0 : index
    %c0_0 = arith.constant 0 : index
    %c0_1 = arith.constant 0 : index
    %0 = vector.load %arg1[%c0, %c0_0, %c0_1] : memref<8x20x48xbf16, #tpu.memory_space<vmem>>, vector<8x16x48xbf16>
    %1 = vector.shape_cast %0 : vector<8x16x48xbf16> to vector<128x48xbf16>
    %c0_2 = arith.constant 0 : index
    %c0_3 = arith.constant 0 : index
    %2 = vector.load %arg5[%c0_2, %c0_3] : memref<128x240xbf16, #tpu.memory_space<vmem>>, vector<128x48xbf16>
    tpu.vector_store %arg5[%c0_2, %c0_3], %1 {strides = array<i32>} : memref<128x240xbf16, #tpu.memory_space<vmem>>, vector<128x48xbf16>,
    %c0_4 = arith.constant 0 : index
    %c1 = arith.constant 1 : index
    %c0_5 = arith.constant 0 : index
    %3 = vector.load %arg1[%c0_4, %c1, %c0_5] : memref<8x20x48xbf16, #tpu.memory_space<vmem>>, vector<8x16x48xbf16>
    %4 = vector.shape_cast %3 : vector<8x16x48xbf16> to vector<128x48xbf16>
    %c0_6 = arith.constant 0 : index
    %c48 = arith.constant 48 : index
    %5 = vector.load %arg5[%c0_6, %c48] : memref<128x240xbf16, #tpu.memory_space<vmem>>, vector<128x48xbf16>
    tpu.vector_store %arg5[%c0_6, %c48], %4 {strides = array<i32>} : memref<128x240xbf16, #tpu.memory_space<vmem>>, vector<128x48xbf16>,
    %c0_7 = arith.constant 0 : index
    %c2 = arith.constant 2 : index
    %c0_8 = arith.constant 0 : index
    %6 = vector.load %arg1[%c0_7, %c2, %c0_8] : memref<8x20x48xbf16, #tpu.memory_space<vmem>>, vector<8x16x48xbf16>
    %7 = vector.shape_cast %6 : vector<8x16x48xbf16> to vector<128x48xbf16>
    %c0_9 = arith.constant 0 : index
    %c96 = arith.constant 96 : index
    %8 = vector.load %arg5[%c0_9, %c96] : memref<128x240xbf16, #tpu.memory_space<vmem>>, vector<128x48xbf16>
    tpu.vector_store %arg5[%c0_9, %c96], %7 {strides = array<i32>} : memref<128x240xbf16, #tpu.memory_space<vmem>>, vector<128x48xbf16>,
    %c0_10 = arith.constant 0 : index
    %c3 = arith.constant 3 : index
    %c0_11 = arith.constant 0 : index
    %9 = vector.load %arg1[%c0_10, %c3, %c0_11] : memref<8x20x48xbf16, #tpu.memory_space<vmem>>, vector<8x16x48xbf16>
    %10 = vector.shape_cast %9 : vector<8x16x48xbf16> to vector<128x48xbf16>
    %c0_12 = arith.constant 0 : index
    %c144 = arith.constant 144 : index
    %11 = vector.load %arg5[%c0_12, %c144] : memref<128x240xbf16, #tpu.memory_space<vmem>>, vector<128x48xbf16>
    tpu.vector_store %arg5[%c0_12, %c144], %10 {strides = array<i32>} : memref<128x240xbf16, #tpu.memory_space<vmem>>, vector<128x48xbf16>,
    %c0_13 = arith.constant 0 : index
    %c4 = arith.constant 4 : index
    %c0_14 = arith.constant 0 : index
    %12 = vector.load %arg1[%c0_13, %c4, %c0_14] : memref<8x20x48xbf16, #tpu.memory_space<vmem>>, vector<8x16x48xbf16>
    %13 = vector.shape_cast %12 : vector<8x16x48xbf16> to vector<128x48xbf16>
    %c0_15 = arith.constant 0 : index
    %c192 = arith.constant 192 : index
    %14 = vector.load %arg5[%c0_15, %c192] : memref<128x240xbf16, #tpu.memory_space<vmem>>, vector<128x48xbf16>
    tpu.vector_store %arg5[%c0_15, %c192], %13 {strides = array<i32>} : memref<128x240xbf16, #tpu.memory_space<vmem>>, vector<128x48xbf16>,
    %c0_16 = arith.constant 0 : index
    %c0_17 = arith.constant 0 : index
    %15 = vector.load %arg5[%c0_16, %c0_17] : memref<128x240xbf16, #tpu.memory_space<vmem>>, vector<128x240xbf16>
    %c0_18 = arith.constant 0 : index
    %c0_19 = arith.constant 0 : index
    %16 = vector.load %arg2[%c0_18, %c0_19] : memref<240x640xbf16, #tpu.memory_space<vmem>>, vector<240x640xbf16>
    %cst = arith.constant dense<0.000000e+00> : vector<128x640xf32>
    %17 = tpu.matmul %15, %16, %cst {dimension_numbers = #tpu.dot_dimension_numbers<[1], [0], [0], [1], [0, 0, 1, 1], [], []>} : vector<128x240xbf16>, vector<240x640xbf16>, vector<128x640xf32> -> vector<128x640xf32>
    %18 = vector.shape_cast %17 : vector<128x640xf32> to vector<8x16x640xf32>
    %cst_20 = arith.constant dense<0xFF800000> : vector<8x640xf32>
    %19 = vector.multi_reduction <maximumf>, %18, %cst_20 [1] : vector<8x16x640xf32> to vector<8x640xf32>
    %c0_21 = arith.constant 0 : index
    %c0_22 = arith.constant 0 : index
    %20 = vector.load %arg3[%c0_21, %c0_22] : memref<1x640xf32, #tpu.memory_space<vmem>>, vector<1x640xf32>
    %21 = vector.broadcast %20 : vector<1x640xf32> to vector<8x640xf32>
    %22 = arith.addf %19, %21 : vector<8x640xf32>
    %cst_23 = arith.constant 0.000000e+00 : f32
    %23 = vector.broadcast %cst_23 : f32 to vector<8x640xf32>
    %24 = arith.maximumf %22, %23 : vector<8x640xf32>
    %c0_24 = arith.constant 0 : index
    %c0_25 = arith.constant 0 : index
    %25 = vector.load %arg4[%c0_24, %c0_25] : memref<8x640xf32, #tpu.memory_space<vmem>>, vector<8x640xf32>
    tpu.vector_store %arg4[%c0_24, %c0_25], %24 {strides = array<i32>} : memref<8x640xf32, #tpu.memory_space<vmem>>, vector<8x640xf32>,
    return
  }
  func.func @transform_0(%arg0: i32) -> (i32, i32, i32) {
    %c0_i32 = arith.constant 0 : i32
    %c0_i32_0 = arith.constant 0 : i32
    %c0_i32_1 = arith.constant 0 : i32
    return %arg0, %c0_i32, %c0_i32_0 : i32, i32, i32
  }
  func.func @transform_1(%arg0: i32) -> (i32, i32) {
    %c0_i32 = arith.constant 0 : i32
    %c0_i32_0 = arith.constant 0 : i32
    %c0_i32_1 = arith.constant 0 : i32
    return %c0_i32, %c0_i32_0 : i32, i32
  }
  func.func @transform_2(%arg0: i32) -> (i32, i32) {
    %c0_i32 = arith.constant 0 : i32
    %c0_i32_0 = arith.constant 0 : i32
    %c0_i32_1 = arith.constant 0 : i32
    return %c0_i32, %c0_i32_0 : i32, i32
  }
  func.func @transform_3(%arg0: i32) -> (i32, i32) {
    %c0_i32 = arith.constant 0 : i32
    %c0_i32_0 = arith.constant 0 : i32
    return %arg0, %c0_i32 : i32, i32
  }
}

</mosaic_0001>

<bundles_post_ra>
// kernel: tpu_custom_call.1
= control target key start
LH: loop header
LB: loop body
LE: loop exit
PB: predicated region body
PF: predicated region fallthrough
CT: control target
= control target key end

     0   :  { %8 = vsyncpa [#allocation5], 0  ;;  %s3807_s0 = inlined_call_operand.vmem [shape: bf16[16,20,48], index: 0, kind: input, shape index: {}]   ;;  %s3808_s1 = inlined_call_operand.hbm [shape: bf16[240,640], index: 1, kind: input, shape index: {}]   ;;  %s3809_s2 = inlined_call_operand.vmem [shape: f32[1,640], index: 2, kind: input, shape index: {}]   ;;  %s3810_s3 = inlined_call_operand.hbm [shape: f32[16,640], index: 3, kind: output, shape index: {}]  }
   0x1   :  { %9 = vsyncpa [#allocation6], 0 }
   0x2   :  { %11 = vsyncpa [#allocation6 + $0x1], 0  ;;  %s3122_s12 = smov 0   ;;  %s3124_s13 = smov 0  }
   0x3   :  { %s3126_s14 = smov 0   ;;  %s3128_s15 = smov 0  }
   0x4 LB: > { %s3143_s16 = sadd.s32 4294967295, %s3091_s15   ;;  %s2628_s17 = sadd.s32 4294967294, %s3091_s15   ;;  %s3091_s15 = sphi %s3128_s15, %s3834_s15   ;;  %s3087_s14 = sphi %s3126_s14, %s3833_s14   ;;  %s3083_s13 = sphi %s3124_s13, %s3832_s13   ;;  %s3079_s12 = sphi %s3122_s12, %s3831_s12  }
   0x5   : > { %s3147_s18 = sadd.s32 1, %s3091_s15   ;;  %s92_s19 = sadd.s32 1, %s3087_s14 }
   0x6   : > { %s89_s20 = ssub.s32 %s3091_s15, %s3147_s18  ;;  %p102_p0 = scmp.ne.s32.totalorder %s3087_s14, %s3083_s13 }
   0x7   : > { %p90_p1 = scmp.eq.s32.totalorder %s89_s20, 0  ;;  %p103_p2 = scmp.eq.s32.totalorder %s3143_s16, 1 }
   0x8   : > { %p108_p3 = scmp.ne.s32.totalorder %s3083_s13, %s3079_s12  ;;  %p109_p4 = scmp.eq.s32.totalorder %s2628_s17, 1 }
   0x9   : > { %s3158_s21 = scalar_select %p90_p1, %s3087_s14, %s92_s19  }
   0xa   : > { %p3160_p5 = por %p103_p2, %p102_p0  ;;  %p3164_p6 = por %p109_p4, %p108_p3 }
   0xb   : > { %p2629_p7 = scmp.ge.s32.totalorder %s3091_s15, 1  ;;  %p116_p8 = scmp.lt.s32.totalorder %s3091_s15, 3 }
   0xc   : > { %s3814_s22 = scalar_select %p3160_p5, 1, 0 }
   0xd   : > { %s3815_s23 = scalar_select %p3164_p6, 1, 0 }
   0xe   : > { %p3811_p9 = scmp.eq.s32.totalorder %s3143_s16, 0  ;;  %p3171_p10 = pnand %p2629_p7, %p116_p8 }
   0xf   : > { %s3093_s25 = smov [#allocation4]   ;;  %s2997_s30 = scalar_lea.hbm %s3808_s1, 9600 }
  0x10   : > { %s3816_s24 = scalar_select %p3171_p10, 1, 0 }
  0x11   : > { %s128_s26 = sshll.u32 %s3093_s25, 4  ;;  %p2833_p11 = pneg %p3171_p10  ;;  %s129_s26 = int_to_ptr.vmem [resolvable:$true] %s128_s26 }
  0x12   : > { %p2998_p13 = scmp.ne.s32.totalorder %s3808_s1, %s2997_s30  ;;  %p3004_p3 = scmp.lt.u32.totalorder %s2997_s30, %s3808_s1 }
  0x13   : > { %p3179_p12 = pnand %p3811_p9, %p2833_p11 }
  0x15   : > { %p2999_p0 = pneg %p3179_p12 }
  0x17   : > { %p3000_p1 = pnand %p2999_p0, %p2998_p13 }
  0x19   : > { %p3001_p2 = pneg %p3000_p1 }
  0x1b   : > { %p3006_p4 = pnand %p3004_p3, %p3001_p2 }
  0x1d   : > { %3009 = shalt.err (!%p3006_p4)
}
  0x1e   : > { %s3010_s8 = scalar_lea.vmem %s129_s26, 9600  ;;  %p3018_p9 = scmp.lt.s32.totalorder %s129_s26, %s129_s26 }
  0x1f   : > { %p3011_p7 = scmp.ne.s32.totalorder %s129_s26, %s3010_s8  ;;  %p3019_p6 = scmp.lt.s32.totalorder %s3010_s8, %s3010_s8 }
  0x21   : > { %p3013_p8 = pnand %p3011_p7, %p2999_p0  ;;  %p3020_p5 = por %p3019_p6, %p3018_p9 }
  0x23   : > { %p3014_p11 = pneg %p3013_p8 }
  0x25   : > { %p3021_p10 = pnand %p3020_p5, %p3014_p11 }
  0x27   : > { %3024 = shalt.err (!%p3021_p10)
}
  0x28   : > { %s3094_s9 = smov 320   ;;  %s3095_s10 = smov 20  }
  0x29   : > { %2836 = dma.hbm_to_vmem [thread:$0]  (!%p3179_p12), %s3808_s1, 9600, %s129_s26, [#allocation5], %s3094_s9, %s3094_s9, %s3095_s10  }
  0x2a   : > { %p3818_p13 = scmp.ne.s32.totalorder %s3816_s24, 0 }
  0x2b   : > { %p3819_p1 = scmp.eq.s32.totalorder (!%p3818_p13), %s3143_s16, 0 }
  0x2c   : > { %157 = sbr.rel (%p3818_p13) target bundleno = 580 (0x244), region = 32 }
  0x33   : > { %3070 = dma.done.wait (%p3819_p1), [#allocation5], 9600   ;;  %p3820_p0 = pmov %p3819_p1 }
  0x34   : > { %s2634_s19 = sshll.u32 %s3143_s16, 3  ;;  %vm1068_vm0 = vcmask 1041408   ;;  %vm1069_vm1 = vcmask 1045508   ;;  %vm587_vm3 = vcmask 1042432   ;;  %vm588_vm4 = vcmask 1046532   ;;  %s3096_s27 = smov 64  }
  0x35   : > { %3072 = vsyncadd (%p3820_p0), [#allocation5], 4294957696  ;;  %p183_p5 = scmp.lt.s32.totalorder %s2634_s19, 15  ;;  %vm736_vm5 = vsmask.f32 2304  ;;  %s3097_s28 = smov 96  }
  0x36   : > { %vm3206_vm2 = vmor %vm1068_vm0, %vm1069_vm1  ;;  %vm737_vm6 = vsmask.f32 6416  ;;  %v2884_v1 = vld [vmem:[#allocation4 + $0x4] ss:$20 sps:$4 sm:$0xff]   ;;  %vm287_vm8 = vsmask.f32 3328 }
  0x37   : > { %s3836_s19 = smov (!%p183_p5, %s2634_s19), 15  ;;  %vm3219_vm7 = vmor %vm587_vm3, %vm588_vm4  ;;  %1705 = vmatprep.subr.bf16.mxu0 %v2884_v1  ;;  %vm288_vm9 = vsmask.f32 7440  ;;  %s3098_s29 = smov 16   ;;  %vm254_vm12 = vcmask 392192   ;;  %vm696_vm13 = vcmask 130048  }
  0x38   : > { %s2825_s20 = smul.u32 12, %s3836_s19  ;;  %vm3243_vm10 = vmor %vm736_vm5, %vm737_vm6  ;;  %s3099_s30 = smov 48   ;;  %v2946_v42 = vld [vmem:[#allocation4 + $0x190] ss:$20 sps:$4 sm:$0xff]   ;;  %v2955_v0 = vld [vmem:[#allocation4 + $0x1c0] ss:$20 sps:$4 sm:$0xff]  }
  0x39   : > { %vm3258_vm11 = vmor %vm287_vm8, %vm288_vm9  ;;  %vm1011_vm14 = vcmask 523392   ;;  %vm1175_vm15 = vcmask 916992   ;;  %vm530_vm0 = vcmask 785792   ;;  %vm694_vm1 = vcmask 1048320   ;;  %s179_s6 = sand.u32 1, %s3083_s13   ;;  %s2826_s9 = smul.u32 640, %s3143_s16 }
  0x3a   : > { %s3213_s26 = scalar_lea.vmem %s3807_s0, %s2825_s20  ;;  %vm2456_vm3 = vcmask 1041409   ;;  %vm2459_vm4 = vcmask 1042434   ;;  %vm2462_vm5 = vcmask 1043459   ;;  %vm2465_vm6 = vcmask 1044484   ;;  %s2824_s7 = smul.u32 40, %s179_s6 }
  0x3b   : > { %v1020_v2 = vld [vmem:[%s3213_s26] sm:$0xc]  ;;  %v1021_v3 = vld [vmem:[%s3213_s26 + $0x4] sm:$0xf]  ;;  %v1022_v4 = vld [vmem:[%s3213_s26 + $0x8] sm:$0x3]  ;;  %s3761_s19 = scalar_lea.hbm %s3810_s3, %s2826_s9 }
  0x3c   : > { %v2676_v5 = vrot.slane %v1020_v2, 10  ;;  %v1073_v6 = vrot.slane %v1021_v3, 6  ;;  %v1076_v7 = vrot.slane %v1022_v4, 6  ;;  %v539_v8 = vld [vmem:[%s3213_s26] sm:$0xe]  ;;  %vm2471_vm8 = vcmask 1046534  }
  0x3d   : > { %v540_v10 = vld [vmem:[%s3213_s26 + $0x4] sm:$0xf]  ;;  %v541_v11 = vld [vmem:[%s3213_s26 + $0x8] sm:$0x1]  ;;  %v2652_v12 = vrot.slane %v539_v8, 9  ;;  %vm2474_vm9 = vcmask 1047559  }
  0x3e   : > { %v1074_v13 = vsel %vm3206_vm2, %v2676_v5, %v1073_v6  ;;  %v1075_v14 = vrot.slane %v1073_v6, 4  ;;  %v592_v15 = vrot.slane %v540_v10, 5  ;;  %v595_v16 = vrot.slane %v541_v11, 5  ;;  %v712_v17 = vld [vmem:[%s3213_s26] sm:$0xe]  ;;  %v2975_v5 = vld [vmem:[%s3213_s26 + $0xc] sm:$0xff]  }
  0x3f   : > { %v713_v18 = vld [vmem:[%s3213_s26 + $0x4] sm:$0xf]  ;;  %v714_v19 = vld [vmem:[%s3213_s26 + $0x8] sm:$0x3]  ;;  %v740_v20 = vshrl.u32 %v712_v17, 16  ;;  %v743_v21 = vshll.u32 %v712_v17, 16 }
  0x40   : > { %v1077_v22 = vsel %vm3206_vm2, %v1075_v14, %v1076_v7  ;;  %v593_v23 = vsel %vm3219_vm7, %v2652_v12, %v592_v15  ;;  %v594_v24 = vrot.slane %v592_v15, 4  ;;  %v749_v25 = vshrl.u32 %v713_v18, 16  ;;  %v263_v26 = vld [vmem:[%s3213_s26] sm:$0xf]  ;;  %v264_v31 = vld [vmem:[%s3213_s26 + $0x4] sm:$0xf] }
  0x41   : > { %v2684_v27 = vcombine.low %v1074_v13, %v1077_v22  ;;  %v742_v28 = vrot.slane %v740_v20, 5  ;;  %v745_v29 = vrot.slane %v743_v21, 6  ;;  %v752_v30 = vshll.u32 %v713_v18, 16  ;;  %v265_v39 = vld [vmem:[%s3213_s26 + $0x8] sm:$0x1]  ;;  %256 = vst.msk [vmem:[#allocation2 + $0x10] sm:$0xff] %vm254_vm12, %v2975_v5 }
  0x42   : > { %v596_v32 = vsel %vm3219_vm7, %v594_v24, %v595_v16  ;;  %v751_v33 = vrot.slane %v749_v25, 5  ;;  %v759_v34 = vshrl.u32 %v714_v19, 16  ;;  %v762_v35 = vshll.u32 %v714_v19, 16  ;;  %v542_v41 = vld [vmem:[%s3213_s26 + $0xc] sm:$0xe]  ;;  %s3740_s8 = scalar_lea.vmem [#allocation7], %s2824_s7 }
  0x43   : > { %1151 = vrot.lane.b32.xlu1 %v2684_v27, %s3096_s27  ;;  %v2660_v36 = vcombine.low %v593_v23, %v596_v32  ;;  %v746_v37 = vor.u32 %v745_v29, %v742_v28  ;;  %v754_v38 = vrot.slane %v752_v30, 6  ;;  %v291_v40 = vshrl.u32 %v263_v26, 16  ;;  %v543_v47 = vld [vmem:[%s3213_s26 + $0x10] sm:$0xf]  ;;  %v544_v52 = vld [vmem:[%s3213_s26 + $0x14] sm:$0x1] }
  0x44   : > { %v761_v43 = vrot.slane %v759_v34, 5  ;;  %v764_v44 = vrot.slane %v762_v35, 6  ;;  %v294_v45 = vshll.u32 %v263_v26, 16  ;;  %v300_v46 = vshll.u32 %v264_v31, 16  ;;  %v715_v57 = vld [vmem:[%s3213_s26 + $0xc] sm:$0xe] }
  0x45   : > { %670 = vrot.lane.b32.xlu0 %v2660_v36, %s3097_s28  ;;  %v747_v48 = vrot.slane %v746_v37, 4  ;;  %v755_v49 = vor.u32 %v754_v38, %v751_v33  ;;  %v293_v50 = vrot.slane %v291_v40, 4  ;;  %v304_v51 = vshrl.u32 %v264_v31, 16  ;;  %v716_v3 = vld [vmem:[%s3213_s26 + $0x10] sm:$0xf]  ;;  %s2557_s10 = sshll.u32 %s3740_s8, 4  ;;  %s3763_s10 = int_to_ptr.vmem [resolvable:$true] %s2557_s10 }
  0x46   : > { %v765_v53 = vor.u32 %v764_v44, %v761_v43  ;;  %v296_v54 = vrot.slane %v294_v45, 5  ;;  %v302_v55 = vrot.slane %v300_v46, 5  ;;  %v310_v56 = vshll.u32 %v265_v39, 16  ;;  %v717_v7 = vld [vmem:[%s3213_s26 + $0x14] sm:$0x3]  ;;  %s2543_s16 = scalar_lea.sflag [#allocation6], %s179_s6 }
  0x47   : > { %v756_v58 = vsel %vm3243_vm10, %v747_v48, %v755_v49  ;;  %v757_v59 = vrot.slane %v755_v49, 4  ;;  %v306_v60 = vrot.slane %v304_v51, 4  ;;  %v2653_v61 = vrot.slane %v542_v41, 9  ;;  %v266_v23 = vld [vmem:[%s3213_s26 + $0xc] sm:$0xf]  ;;  %s3025_s20 = scalar_lea.vmem %s3763_s10, 640 }
  0x48   : > { %v297_v62 = vor.u32 %v296_v54, %v293_v50  ;;  %v312_v63 = vrot.slane %v310_v56, 5  ;;  %v599_v1 = vrot.slane %v543_v47, 5  ;;  %v602_v2 = vrot.slane %v544_v52, 5  ;;  %v267_v24 = vld [vmem:[%s3213_s26 + $0x10] sm:$0xf]  ;;  %p3026_p6 = scmp.ne.s32.totalorder %s3763_s10, %s3025_s20  ;;  %p3829_p9 = scmp.ne.s32.totalorder %s3814_s22, 0 }
  0x49   : > { %v766_v4 = vsel %vm3243_vm10, %v757_v59, %v765_v53  ;;  %v307_v6 = vor.u32 %v306_v60, %v302_v55  ;;  %v768_v8 = vshrl.u32 %v715_v57, 16  ;;  %v771_v10 = vshll.u32 %v715_v57, 16  ;;  %v268_v29 = vld [vmem:[%s3213_s26 + $0x14] sm:$0x1]  ;;  %v1023_v30 = vld [vmem:[%s3213_s26 + $0xc] sm:$0xc] }
  0x4a   : > { %v2668_v11 = vcombine.low %v756_v58, %v766_v4  ;;  %v298_v12 = vrot.slane %v297_v62, 4  ;;  %v600_v13 = vsel %vm3219_vm7, %v2653_v61, %v599_v1  ;;  %v601_v14 = vrot.slane %v599_v1, 4  ;;  %v1024_v35 = vld [vmem:[%s3213_s26 + $0x10] sm:$0xf]  ;;  %v1025_v40 = vld [vmem:[%s3213_s26 + $0x14] sm:$0x3]  ;;  %p3027_p10 = pnand %p3026_p6, %p3829_p9 }
  0x4b   : > { %v308_v15 = vrot.slane %v307_v6, 4  ;;  %v770_v16 = vrot.slane %v768_v8, 5  ;;  %v773_v17 = vrot.slane %v771_v10, 6  ;;  %v777_v18 = vshrl.u32 %v716_v3, 16  ;;  %v545_v46 = vld [vmem:[%s3213_s26 + $0x18] sm:$0xe] }
  0x4c   : > { %987 = vrot.lane.b32.xlu0 %v2668_v11, %s3098_s29  ;;  %v303_v19 = vsel %vm3258_vm11, %v298_v12, %v302_v55  ;;  %v603_v20 = vsel %vm3219_vm7, %v601_v14, %v602_v2  ;;  %v780_v21 = vshll.u32 %v716_v3, 16  ;;  %v787_v22 = vshrl.u32 %v717_v7, 16  ;;  %v546_v51 = vld [vmem:[%s3213_s26 + $0x1c] sm:$0xf]  ;;  %v547_v60 = vld [vmem:[%s3213_s26 + $0x20] sm:$0x1]  ;;  %p3028_p12 = pneg %p3027_p10 }
  0x4d   : > { %v313_v25 = vsel %vm3258_vm11, %v308_v15, %v312_v63  ;;  %v2661_v26 = vcombine.low %v600_v13, %v603_v20  ;;  %v774_v27 = vor.u32 %v773_v17, %v770_v16  ;;  %v779_v28 = vrot.slane %v777_v18, 5  ;;  %v718_v2 = vld [vmem:[%s3213_s26 + $0x18] sm:$0xe]  ;;  %v719_v8 = vld [vmem:[%s3213_s26 + $0x1c] sm:$0xf]  ;;  %s3101_s24 = smov [#allocation7]  }
  0x4e   : > { %v2644_v31 = vcombine.low %v303_v19, %v313_v25  ;;  %v782_v32 = vrot.slane %v780_v21, 6  ;;  %v789_v33 = vrot.slane %v787_v22, 5  ;;  %v790_v34 = vshll.u32 %v717_v7, 16  ;;  %v720_v16 = vld [vmem:[%s3213_s26 + $0x20] sm:$0x3]  ;;  %s3029_s25 = sshll.u32 %s3101_s24, 4  ;;  %s3030_s25 = int_to_ptr.vmem [resolvable:$false] %s3029_s25 }
  0x4f   : > { %v775_v36 = vrot.slane %v774_v27, 4  ;;  %v315_v37 = vshrl.u32 %v266_v23, 16  ;;  %v318_v38 = vshll.u32 %v266_v23, 16  ;;  %v324_v39 = vshll.u32 %v267_v24, 16  ;;  %v269_v23 = vld [vmem:[%s3213_s26 + $0x18] sm:$0xf]  ;;  %p3032_p2 = scmp.lt.s32.totalorder %s3763_s10, %s3030_s25 }
  0x50   : > { %506 = vrot.lane.b32.xlu1 %v2644_v31, %s3099_s30  ;;  %672 = vrot.lane.b32.xlu0 %v2661_v26, %s3097_s28  ;;  %v783_v41 = vor.u32 %v782_v32, %v779_v28  ;;  %v792_v43 = vrot.slane %v790_v34, 6  ;;  %v328_v44 = vshrl.u32 %v267_v24, 16  ;;  %v334_v45 = vshll.u32 %v268_v29, 16  ;;  %v270_v24 = vld [vmem:[%s3213_s26 + $0x1c] sm:$0xf] }
  0x51   : > { %v317_v47 = vrot.slane %v315_v37, 4  ;;  %v320_v48 = vrot.slane %v318_v38, 5  ;;  %v326_v49 = vrot.slane %v324_v39, 5  ;;  %v2677_v50 = vrot.slane %v1023_v30, 10  ;;  %v271_v29 = vld [vmem:[%s3213_s26 + $0x20] sm:$0x1] }
  0x52   : > { %v784_v52 = vsel %vm3243_vm10, %v775_v36, %v783_v41  ;;  %v785_v53 = vrot.slane %v783_v41, 4  ;;  %v793_v54 = vor.u32 %v792_v43, %v789_v33  ;;  %v330_v55 = vrot.slane %v328_v44, 4  ;;  %v1026_v34 = vld [vmem:[%s3213_s26 + $0x18] sm:$0xc]  ;;  %v1027_v39 = vld [vmem:[%s3213_s26 + $0x1c] sm:$0xf] }
  0x53   : > { %v321_v56 = vor.u32 %v320_v48, %v317_v47  ;;  %v336_v57 = vrot.slane %v334_v45, 5  ;;  %v1080_v58 = vrot.slane %v1024_v35, 6  ;;  %v1083_v59 = vrot.slane %v1025_v40, 6  ;;  %v1028_v45 = vld [vmem:[%s3213_s26 + $0x20] sm:$0x3] }
  0x54   : > { %v794_v61 = vsel %vm3243_vm10, %v785_v53, %v793_v54  ;;  %v331_v62 = vor.u32 %v330_v55, %v326_v49  ;;  %v2654_v63 = vrot.slane %v545_v46, 9  ;;  %v606_v1 = vrot.slane %v546_v51, 5  ;;  %v548_v54 = vld [vmem:[%s3213_s26 + $0x24] sm:$0xe]  ;;  %v549_v55 = vld [vmem:[%s3213_s26 + $0x28] sm:$0xf] }
  0x55   : > { %v2669_v3 = vcombine.low %v784_v52, %v794_v61  ;;  %v322_v4 = vrot.slane %v321_v56, 4  ;;  %v1081_v6 = vsel %vm3206_vm2, %v2677_v50, %v1080_v58  ;;  %v1082_v7 = vrot.slane %v1080_v58, 4 }
  0x56   : > { %v332_v10 = vrot.slane %v331_v62, 4  ;;  %v607_v11 = vsel %vm3219_vm7, %v2654_v63, %v606_v1  ;;  %v608_v12 = vrot.slane %v606_v1, 4  ;;  %v609_v13 = vrot.slane %v547_v60, 5  ;;  %v550_v60 = vld [vmem:[%s3213_s26 + $0x2c] sm:$0x1] }
  0x57   : > { %989 = vrot.lane.b32.xlu1 %v2669_v3, %s3098_s29  ;;  %v327_v14 = vsel %vm3258_vm11, %v322_v4, %v326_v49  ;;  %v1084_v15 = vsel %vm3206_vm2, %v1082_v7, %v1083_v59  ;;  %v796_v17 = vshrl.u32 %v718_v2, 16  ;;  %v799_v18 = vshll.u32 %v718_v2, 16  ;;  %v721_v2 = vld [vmem:[%s3213_s26 + $0x24] sm:$0xe] }
  0x58   : > { %v337_v19 = vsel %vm3258_vm11, %v332_v10, %v336_v57  ;;  %v2685_v20 = vcombine.low %v1081_v6, %v1084_v15  ;;  %v610_v21 = vsel %vm3219_vm7, %v608_v12, %v609_v13  ;;  %v805_v22 = vshrl.u32 %v719_v8, 16  ;;  %v722_v13 = vld [vmem:[%s3213_s26 + $0x28] sm:$0xf] }
  0x59   : > { %v2645_v25 = vcombine.low %v327_v14, %v337_v19  ;;  %v2662_v26 = vcombine.low %v607_v11, %v610_v21  ;;  %v798_v27 = vrot.slane %v796_v17, 5  ;;  %v801_v28 = vrot.slane %v799_v18, 6  ;;  %v723_v17 = vld [vmem:[%s3213_s26 + $0x2c] sm:$0x3] }
  0x5a   : > { %v807_v30 = vrot.slane %v805_v22, 5  ;;  %v808_v31 = vshll.u32 %v719_v8, 16  ;;  %v815_v32 = vshrl.u32 %v720_v16, 16  ;;  %v818_v33 = vshll.u32 %v720_v16, 16 }
  0x5b   : > { %508 = vrot.lane.b32.xlu0 %v2645_v25, %s3099_s30  ;;  %1153 = vrot.lane.b32.xlu1 %v2685_v20, %s3096_s27  ;;  %v802_v35 = vor.u32 %v801_v28, %v798_v27  ;;  %v339_v36 = vshrl.u32 %v269_v23, 16  ;;  %v342_v37 = vshll.u32 %v269_v23, 16  ;;  %v348_v38 = vshll.u32 %v270_v24, 16  ;;  %v272_v23 = vld [vmem:[%s3213_s26 + $0x24] sm:$0xf] }
  0x5c   : > { %v810_v40 = vrot.slane %v808_v31, 6  ;;  %v817_v41 = vrot.slane %v815_v32, 5  ;;  %v820_v43 = vrot.slane %v818_v33, 6  ;;  %v352_v44 = vshrl.u32 %v270_v24, 16  ;;  %v273_v32 = vld [vmem:[%s3213_s26 + $0x28] sm:$0xf] }
  0x5d   : > { %v803_v46 = vrot.slane %v802_v35, 4  ;;  %v341_v47 = vrot.slane %v339_v36, 4  ;;  %v344_v48 = vrot.slane %v342_v37, 5  ;;  %v350_v49 = vrot.slane %v348_v38, 5  ;;  %v274_v36 = vld [vmem:[%s3213_s26 + $0x2c] sm:$0x1] }
  0x5e   : > { %v811_v50 = vor.u32 %v810_v40, %v807_v30  ;;  %v821_v51 = vor.u32 %v820_v43, %v817_v41  ;;  %v354_v52 = vrot.slane %v352_v44, 4  ;;  %v358_v53 = vshll.u32 %v271_v29, 16  ;;  %v1029_v43 = vld [vmem:[%s3213_s26 + $0x24] sm:$0xc] }
  0x5f   : > { %674 = vrot.lane.b32.xlu0 %v2662_v26, %s3097_s28  ;;  %v345_v56 = vor.u32 %v344_v48, %v341_v47  ;;  %v2678_v57 = vrot.slane %v1026_v34, 10  ;;  %v1087_v58 = vrot.slane %v1027_v39, 6  ;;  %v1090_v59 = vrot.slane %v1028_v45, 6  ;;  %v1030_v48 = vld [vmem:[%s3213_s26 + $0x28] sm:$0xf] }
  0x60   : > { %v812_v61 = vsel %vm3243_vm10, %v803_v46, %v811_v50  ;;  %v813_v62 = vrot.slane %v811_v50, 4  ;;  %v355_v63 = vor.u32 %v354_v52, %v350_v49  ;;  %v360_v1 = vrot.slane %v358_v53, 5  ;;  %v1031_v53 = vld [vmem:[%s3213_s26 + $0x2c] sm:$0x3] }
  0x61   : > { %v346_v3 = vrot.slane %v345_v56, 4  ;;  %v1088_v4 = vsel %vm3206_vm2, %v2678_v57, %v1087_v58  ;;  %v1089_v6 = vrot.slane %v1087_v58, 4  ;;  %v2655_v7 = vrot.slane %v548_v54, 9  ;;  %v551_v54 = vld [vmem:[%s3213_s26 + $0x30] sm:$0xe] }
  0x62   : > { %v822_v8 = vsel %vm3243_vm10, %v813_v62, %v821_v51  ;;  %v356_v10 = vrot.slane %v355_v63, 4  ;;  %v613_v11 = vrot.slane %v549_v55, 5  ;;  %v616_v12 = vrot.slane %v550_v60, 5 }
  0x63   : > { %v2670_v14 = vcombine.low %v812_v61, %v822_v8  ;;  %v351_v15 = vsel %vm3258_vm11, %v346_v3, %v350_v49  ;;  %v1091_v16 = vsel %vm3206_vm2, %v1089_v6, %v1090_v59  ;;  %v824_v18 = vshrl.u32 %v721_v2, 16  ;;  %v552_v59 = vld [vmem:[%s3213_s26 + $0x34] sm:$0xf] }
  0x64   : > { %v361_v19 = vsel %vm3258_vm11, %v356_v10, %v360_v1  ;;  %v2686_v20 = vcombine.low %v1088_v4, %v1091_v16  ;;  %v614_v21 = vsel %vm3219_vm7, %v2655_v7, %v613_v11  ;;  %v615_v22 = vrot.slane %v613_v11, 4  ;;  %v553_v1 = vld [vmem:[%s3213_s26 + $0x38] sm:$0x1]  ;;  %v724_v7 = vld [vmem:[%s3213_s26 + $0x30] sm:$0xe] }
  0x65   : > { %991 = vrot.lane.b32.xlu1 %v2670_v14, %s3098_s29  ;;  %v2646_v24 = vcombine.low %v351_v15, %v361_v19  ;;  %v826_v25 = vrot.slane %v824_v18, 5  ;;  %v827_v26 = vshll.u32 %v721_v2, 16  ;;  %v833_v27 = vshrl.u32 %v722_v13, 16 }
  0x66   : > { %v617_v28 = vsel %vm3219_vm7, %v615_v22, %v616_v12  ;;  %v836_v29 = vshll.u32 %v722_v13, 16  ;;  %v843_v30 = vshrl.u32 %v723_v17, 16  ;;  %v846_v31 = vshll.u32 %v723_v17, 16  ;;  %v725_v17 = vld [vmem:[%s3213_s26 + $0x34] sm:$0xf] }
  0x67   : > { %510 = vrot.lane.b32.xlu0 %v2646_v24, %s3099_s30  ;;  %v2663_v33 = vcombine.low %v614_v21, %v617_v28  ;;  %v829_v34 = vrot.slane %v827_v26, 6  ;;  %v835_v35 = vrot.slane %v833_v27, 5  ;;  %v363_v37 = vshrl.u32 %v272_v23, 16  ;;  %v275_v27 = vld [vmem:[%s3213_s26 + $0x30] sm:$0xf] }
  0x68   : > { %v838_v38 = vrot.slane %v836_v29, 6  ;;  %v845_v39 = vrot.slane %v843_v30, 5  ;;  %v848_v40 = vrot.slane %v846_v31, 6  ;;  %v366_v41 = vshll.u32 %v272_v23, 16 }
  0x69   : > { %1155 = vrot.lane.b32.xlu1 %v2686_v20, %s3096_s27  ;;  %v830_v44 = vor.u32 %v829_v34, %v826_v25  ;;  %v365_v45 = vrot.slane %v363_v37, 4  ;;  %v372_v46 = vshll.u32 %v273_v32, 16  ;;  %v376_v47 = vshrl.u32 %v273_v32, 16  ;;  %v726_v20 = vld [vmem:[%s3213_s26 + $0x38] sm:$0x3] }
  0x6a   : > { %v839_v49 = vor.u32 %v838_v38, %v835_v35  ;;  %v849_v50 = vor.u32 %v848_v40, %v845_v39  ;;  %v368_v51 = vrot.slane %v366_v41, 5  ;;  %v382_v52 = vshll.u32 %v274_v36, 16  ;;  %v276_v36 = vld [vmem:[%s3213_s26 + $0x34] sm:$0xf]  ;;  %v277_v40 = vld [vmem:[%s3213_s26 + $0x38] sm:$0x1] }
  0x6b   : > { %676 = vrot.lane.b32.xlu0 %v2663_v33, %s3097_s28  ;;  %v831_v55 = vrot.slane %v830_v44, 4  ;;  %v374_v56 = vrot.slane %v372_v46, 5  ;;  %v378_v57 = vrot.slane %v376_v47, 4  ;;  %v2679_v58 = vrot.slane %v1029_v43, 10  ;;  %v1032_v43 = vld [vmem:[%s3213_s26 + $0x30] sm:$0xc] }
  0x6c   : > { %v841_v60 = vrot.slane %v839_v49, 4  ;;  %v369_v61 = vor.u32 %v368_v51, %v365_v45  ;;  %v384_v62 = vrot.slane %v382_v52, 5  ;;  %v1094_v63 = vrot.slane %v1030_v48, 6  ;;  %v1033_v48 = vld [vmem:[%s3213_s26 + $0x34] sm:$0xf] }
  0x6d   : > { %v840_v2 = vsel %vm3243_vm10, %v831_v55, %v839_v49  ;;  %v379_v3 = vor.u32 %v378_v57, %v374_v56  ;;  %v1097_v4 = vrot.slane %v1031_v53, 6  ;;  %v2656_v6 = vrot.slane %v551_v54, 9  ;;  %v1034_v57 = vld [vmem:[%s3213_s26 + $0x38] sm:$0x3] }
  0x6e   : > { %v850_v8 = vsel %vm3243_vm10, %v841_v60, %v849_v50  ;;  %v370_v10 = vrot.slane %v369_v61, 4  ;;  %v1095_v11 = vsel %vm3206_vm2, %v2679_v58, %v1094_v63  ;;  %v1096_v12 = vrot.slane %v1094_v63, 4  ;;  %v554_v58 = vld [vmem:[%s3213_s26 + $0x3c] sm:$0xe]  ;;  %v555_v63 = vld [vmem:[%s3213_s26 + $0x40] sm:$0xf] }
  0x6f   : > { %v2671_v13 = vcombine.low %v840_v2, %v850_v8  ;;  %v380_v14 = vrot.slane %v379_v3, 4  ;;  %v620_v15 = vrot.slane %v552_v59, 5  ;;  %v623_v16 = vrot.slane %v553_v1, 5 }
  0x70   : > { %v375_v18 = vsel %vm3258_vm11, %v370_v10, %v374_v56  ;;  %v1098_v19 = vsel %vm3206_vm2, %v1096_v12, %v1097_v4  ;;  %v852_v21 = vshrl.u32 %v724_v7, 16  ;;  %v855_v22 = vshll.u32 %v724_v7, 16  ;;  %v727_v12 = vld [vmem:[%s3213_s26 + $0x3c] sm:$0xe] }
  0x71   : > { %993 = vrot.lane.b32.xlu1 %v2671_v13, %s3098_s29  ;;  %v385_v23 = vsel %vm3258_vm11, %v380_v14, %v384_v62  ;;  %v2687_v24 = vcombine.low %v1095_v11, %v1098_v19  ;;  %v621_v25 = vsel %vm3219_vm7, %v2656_v6, %v620_v15  ;;  %v622_v26 = vrot.slane %v620_v15, 4  ;;  %v556_v6 = vld [vmem:[%s3213_s26 + $0x44] sm:$0x1] }
  0x72   : > { %v2647_v28 = vcombine.low %v375_v18, %v385_v23  ;;  %v854_v29 = vrot.slane %v852_v21, 5  ;;  %v857_v30 = vrot.slane %v855_v22, 6  ;;  %v861_v31 = vshrl.u32 %v725_v17, 16  ;;  %v729_v22 = vld [vmem:[%s3213_s26 + $0x44] sm:$0x3] }
  0x73   : > { %v624_v32 = vsel %vm3219_vm7, %v622_v26, %v623_v16  ;;  %v864_v33 = vshll.u32 %v725_v17, 16  ;;  %v871_v34 = vshrl.u32 %v726_v20, 16  ;;  %v874_v35 = vshll.u32 %v726_v20, 16  ;;  %v728_v17 = vld [vmem:[%s3213_s26 + $0x40] sm:$0xf] }
  0x74   : > { %512 = vrot.lane.b32.xlu0 %v2647_v28, %s3099_s30  ;;  %v2664_v37 = vcombine.low %v621_v25, %v624_v32  ;;  %v858_v38 = vor.u32 %v857_v30, %v854_v29  ;;  %v863_v39 = vrot.slane %v861_v31, 5  ;;  %v387_v41 = vshrl.u32 %v275_v27, 16  ;;  %v278_v23 = vld [vmem:[%s3213_s26 + $0x3c] sm:$0xf]  ;;  %v279_v28 = vld [vmem:[%s3213_s26 + $0x40] sm:$0xf] }
  0x75   : > { %1157 = vrot.lane.b32.xlu1 %v2687_v24, %s3096_s27  ;;  %v866_v44 = vrot.slane %v864_v33, 6  ;;  %v873_v45 = vrot.slane %v871_v34, 5  ;;  %v876_v46 = vrot.slane %v874_v35, 6  ;;  %v390_v47 = vshll.u32 %v275_v27, 16  ;;  %v2886_v29 = vld [vmem:[#allocation4] ss:$20 sps:$4 sm:$0xff]  }
  0x76   : > { %v859_v49 = vrot.slane %v858_v38, 4  ;;  %v389_v50 = vrot.slane %v387_v41, 4  ;;  %v396_v51 = vshll.u32 %v276_v36, 16  ;;  %v400_v52 = vshrl.u32 %v276_v36, 16  ;;  %v2887_v30 = vld [vmem:[#allocation4 + $0xc] ss:$20 sps:$4 sm:$0xff]   ;;  %1706 = vmatpush1.bf16.msra.mxu0 %v2886_v29 }
  0x77   : > { %v867_v53 = vor.u32 %v866_v44, %v863_v39  ;;  %v877_v54 = vor.u32 %v876_v46, %v873_v45  ;;  %v392_v55 = vrot.slane %v390_v47, 5  ;;  %v406_v56 = vshll.u32 %v277_v40, 16  ;;  %v280_v35 = vld [vmem:[%s3213_s26 + $0x44] sm:$0x1]  ;;  %v2889_v36 = vld [vmem:[#allocation4 + $0x8] ss:$20 sps:$4 sm:$0xff]   ;;  %1818 = vmatprep.subr.bf16.mxu1 %v2887_v30 }
  0x78   : > { %678 = vrot.lane.b32.xlu0 %v2664_v37, %s3097_s28  ;;  %v398_v59 = vrot.slane %v396_v51, 5  ;;  %v402_v60 = vrot.slane %v400_v52, 4  ;;  %v2680_v61 = vrot.slane %v1032_v43, 10  ;;  %v1101_v62 = vrot.slane %v1033_v48, 6  ;;  %v2890_v41 = vld [vmem:[#allocation4 + $0x2c] ss:$20 sps:$4 sm:$0xff]   ;;  %1819 = vmatpush1.bf16.msra.mxu1 %v2889_v36 }
  0x79   : > { %v868_v1 = vsel %vm3243_vm10, %v859_v49, %v867_v53  ;;  %v869_v2 = vrot.slane %v867_v53, 4  ;;  %v393_v3 = vor.u32 %v392_v55, %v389_v50  ;;  %v408_v4 = vrot.slane %v406_v56, 5  ;;  %v2892_v43 = vld [vmem:[#allocation4 + $0x28] ss:$20 sps:$4 sm:$0xff]   ;;  %1707 = vmatprep.subr.bf16.mxu0 %v2890_v41  ;;  %v2895_v55 = vld [vmem:[#allocation4 + $0x30] ss:$20 sps:$4 sm:$0xff]  }
  0x7a   : > { %v403_v7 = vor.u32 %v402_v60, %v398_v59  ;;  %v1102_v8 = vsel %vm3206_vm2, %v2680_v61, %v1101_v62  ;;  %v1103_v10 = vrot.slane %v1101_v62, 4  ;;  %v1104_v11 = vrot.slane %v1034_v57, 6  ;;  %v1035_v48 = vld [vmem:[%s3213_s26 + $0x3c] sm:$0xc]  ;;  %v2893_v49 = vld [vmem:[#allocation4 + $0x34] ss:$20 sps:$4 sm:$0xff]   ;;  %1708 = vmatpush1.bf16.msra.mxu0 %v2892_v43 }
  0x7b   : > { %v878_v13 = vsel %vm3243_vm10, %v869_v2, %v877_v54  ;;  %v394_v14 = vrot.slane %v393_v3, 4  ;;  %v2657_v15 = vrot.slane %v554_v58, 9  ;;  %v627_v16 = vrot.slane %v555_v63, 5  ;;  %v1036_v54 = vld [vmem:[%s3213_s26 + $0x40] sm:$0xf]  ;;  %1820 = vmatprep.subr.bf16.mxu1 %v2893_v49 }
  0x7c   : > { %v2672_v18 = vcombine.low %v868_v1, %v878_v13  ;;  %v404_v19 = vrot.slane %v403_v7, 4  ;;  %v1105_v20 = vsel %vm3206_vm2, %v1103_v10, %v1104_v11  ;;  %v630_v21 = vrot.slane %v556_v6, 5  ;;  %v3407_v60 = vld [vmem:[%s3213_s26 + $0x44] sm:$0x3]  ;;  %v557_v61 = vld [vmem:[%s3213_s26 + $0x48] sm:$0xe]  ;;  %1821 = vmatpush1.bf16.msra.mxu1 %v2895_v55 }
  0x7d   : > { %v399_v24 = vsel %vm3258_vm11, %v394_v14, %v398_v59  ;;  %v2688_v25 = vcombine.low %v1102_v8, %v1105_v20  ;;  %v628_v26 = vsel %vm3219_vm7, %v2657_v15, %v627_v16  ;;  %v629_v27 = vrot.slane %v627_v16, 4  ;;  %v558_v62 = vld [vmem:[%s3213_s26 + $0x4c] sm:$0xf]  ;;  %v2896_v63 = vld [vmem:[#allocation4 + $0x54] ss:$20 sps:$4 sm:$0xff]  }
  0x7e   : > { %995 = vrot.lane.b32.xlu1 %v2672_v18, %s3098_s29  ;;  %v409_v31 = vsel %vm3258_vm11, %v404_v19, %v408_v4  ;;  %v880_v32 = vshrl.u32 %v727_v12, 16  ;;  %v883_v33 = vshll.u32 %v727_v12, 16  ;;  %v889_v34 = vshrl.u32 %v728_v17, 16  ;;  %v2898_v6 = vld [vmem:[#allocation4 + $0x50] ss:$20 sps:$4 sm:$0xff]   ;;  %1709 = vmatprep.subr.bf16.mxu0 %v2896_v63 }
  0x7f   : > { %v2648_v37 = vcombine.low %v399_v24, %v409_v31  ;;  %v631_v38 = vsel %vm3219_vm7, %v629_v27, %v630_v21  ;;  %v892_v39 = vshll.u32 %v728_v17, 16  ;;  %v899_v40 = vshrl.u32 %v729_v22, 16  ;;  %v559_v12 = vld [vmem:[%s3213_s26 + $0x50] sm:$0x1]  ;;  %v730_v18 = vld [vmem:[%s3213_s26 + $0x48] sm:$0xe]  ;;  %1710 = vmatpush1.bf16.msra.mxu0 %v2898_v6 }
  0x80   : > { %v2665_v44 = vcombine.low %v628_v26, %v631_v38  ;;  %v882_v45 = vrot.slane %v880_v32, 5  ;;  %v885_v46 = vrot.slane %v883_v33, 6  ;;  %v891_v47 = vrot.slane %v889_v34, 5  ;;  %v2899_v13 = vld [vmem:[#allocation4 + $0x5c] ss:$20 sps:$4 sm:$0xff]  }
  0x81   : > { %514 = vrot.lane.b32.xlu0 %v2648_v37, %s3099_s30  ;;  %v894_v50 = vrot.slane %v892_v39, 6  ;;  %v901_v51 = vrot.slane %v899_v40, 5  ;;  %v902_v52 = vshll.u32 %v729_v22, 16  ;;  %v411_v53 = vshrl.u32 %v278_v23, 16  ;;  %v2901_v19 = vld [vmem:[#allocation4 + $0x58] ss:$20 sps:$4 sm:$0xff]   ;;  %1822 = vmatprep.subr.bf16.mxu1 %v2899_v13 }
  0x82   : > { %1159 = vrot.lane.b32.xlu1 %v2688_v25, %s3096_s27  ;;  %v886_v56 = vor.u32 %v885_v46, %v882_v45  ;;  %v414_v57 = vshll.u32 %v278_v23, 16  ;;  %v420_v58 = vshll.u32 %v279_v28, 16  ;;  %v424_v59 = vshrl.u32 %v279_v28, 16  ;;  %v3417_v24 = vld [vmem:[%s3213_s26 + $0x4c] sm:$0xf]  ;;  %1823 = vmatpush1.bf16.msra.mxu1 %v2901_v19 }
  0x83   : > { %v895_v1 = vor.u32 %v894_v50, %v891_v47  ;;  %v904_v2 = vrot.slane %v902_v52, 6  ;;  %v413_v3 = vrot.slane %v411_v53, 4  ;;  %v430_v4 = vshll.u32 %v280_v35, 16  ;;  %v2902_v25 = vld [vmem:[#allocation4 + $0x7c] ss:$20 sps:$4 sm:$0xff]  }
  0x84   : > { %v887_v7 = vrot.slane %v886_v56, 4  ;;  %v416_v8 = vrot.slane %v414_v57, 5  ;;  %v422_v10 = vrot.slane %v420_v58, 5  ;;  %v426_v11 = vrot.slane %v424_v59, 4  ;;  %v2904_v26 = vld [vmem:[#allocation4 + $0x78] ss:$20 sps:$4 sm:$0xff]   ;;  %1711 = vmatprep.subr.bf16.mxu0 %v2902_v25 }
  0x85   : > { %680 = vrot.lane.b32.xlu0 %v2665_v44, %s3097_s28  ;;  %v897_v14 = vrot.slane %v895_v1, 4  ;;  %v905_v15 = vor.u32 %v904_v2, %v901_v51  ;;  %v432_v16 = vrot.slane %v430_v4, 5  ;;  %v2681_v17 = vrot.slane %v1035_v48, 10  ;;  %v2905_v31 = vld [vmem:[#allocation4 + $0x84] ss:$20 sps:$4 sm:$0xff]   ;;  %1712 = vmatpush1.bf16.msra.mxu0 %v2904_v26 }
  0x86   : > { %v896_v20 = vsel %vm3243_vm10, %v887_v7, %v895_v1  ;;  %v417_v21 = vor.u32 %v416_v8, %v413_v3  ;;  %v427_v22 = vor.u32 %v426_v11, %v422_v10  ;;  %v1108_v23 = vrot.slane %v1036_v54, 6  ;;  %v2907_v36 = vld [vmem:[#allocation4 + $0x80] ss:$20 sps:$4 sm:$0xff]   ;;  %v2908_v37 = vld [vmem:[#allocation4 + $0xa4] ss:$20 sps:$4 sm:$0xff]   ;;  %1824 = vmatprep.subr.bf16.mxu1 %v2905_v31 }
  0x87   : > { %v906_v27 = vsel %vm3243_vm10, %v897_v14, %v905_v15  ;;  %v1111_v28 = vrot.slane %v3407_v60, 6  ;;  %v2658_v29 = vrot.slane %v557_v61, 9  ;;  %v634_v30 = vrot.slane %v558_v62, 5  ;;  %v732_v43 = vld [vmem:[%s3213_s26 + $0x50] sm:$0x3]  ;;  %1825 = vmatpush1.bf16.msra.mxu1 %v2907_v36  ;;  %1713 = vmatprep.subr.bf16.mxu0 %v2908_v37 }
  0x88   : > { %v2673_v32 = vcombine.low %v896_v20, %v906_v27  ;;  %v418_v33 = vrot.slane %v417_v21, 4  ;;  %v428_v34 = vrot.slane %v427_v22, 4  ;;  %v1109_v35 = vsel %vm3206_vm2, %v2681_v17, %v1108_v23  ;;  %v281_v48 = vld [vmem:[%s3213_s26 + $0x48] sm:$0xf]  ;;  %v2911_v49 = vld [vmem:[#allocation4 + $0xac] ss:$20 sps:$4 sm:$0xff]  }
  0x89   : > { %v1110_v38 = vrot.slane %v1108_v23, 4  ;;  %v635_v39 = vsel %vm3219_vm7, %v2658_v29, %v634_v30  ;;  %v636_v40 = vrot.slane %v634_v30, 4  ;;  %v637_v41 = vrot.slane %v559_v12, 5  ;;  %v282_v54 = vld [vmem:[%s3213_s26 + $0x4c] sm:$0xf]  ;;  %1826 = vmatprep.subr.bf16.mxu1 %v2911_v49 }
  0x8a   : > { %997 = vrot.lane.b32.xlu1 %v2673_v32, %s3098_s29  ;;  %v423_v44 = vsel %vm3258_vm11, %v418_v33, %v422_v10  ;;  %v433_v45 = vsel %vm3258_vm11, %v428_v34, %v432_v16  ;;  %v908_v46 = vshrl.u32 %v730_v18, 16  ;;  %v911_v47 = vshll.u32 %v730_v18, 16  ;;  %v2910_v55 = vld [vmem:[#allocation4 + $0xa0] ss:$20 sps:$4 sm:$0xff]   ;;  %v283_v60 = vld [vmem:[%s3213_s26 + $0x50] sm:$0x1] }
  0x8b   : > { %v2649_v50 = vcombine.low %v423_v44, %v433_v45  ;;  %v1112_v51 = vsel %vm3206_vm2, %v1110_v38, %v1111_v28  ;;  %v638_v52 = vsel %vm3219_vm7, %v636_v40, %v637_v41  ;;  %v917_v53 = vshrl.u32 %v3417_v24, 16  ;;  %v2913_v61 = vld [vmem:[#allocation4 + $0xa8] ss:$20 sps:$4 sm:$0xff]   ;;  %v2914_v62 = vld [vmem:[#allocation4 + $0xcc] ss:$20 sps:$4 sm:$0xff]   ;;  %1714 = vmatpush1.bf16.msra.mxu0 %v2910_v55 }
  0x8c   : > { %v2689_v56 = vcombine.low %v1109_v35, %v1112_v51  ;;  %v2666_v57 = vcombine.low %v635_v39, %v638_v52  ;;  %v910_v58 = vrot.slane %v908_v46, 5  ;;  %v913_v59 = vrot.slane %v911_v47, 6  ;;  %v1038_v4 = vld [vmem:[%s3213_s26 + $0x48] sm:$0xc]  ;;  %v1039_v6 = vld [vmem:[%s3213_s26 + $0x4c] sm:$0xf]  ;;  %1827 = vmatpush1.bf16.msra.mxu1 %v2913_v61  ;;  %1715 = vmatprep.subr.bf16.mxu0 %v2914_v62 }
  0x8d   : > { %516 = vrot.lane.b32.xlu0 %v2649_v50, %s3099_s30  ;;  %v919_v63 = vrot.slane %v917_v53, 5  ;;  %v920_v1 = vshll.u32 %v3417_v24, 16  ;;  %v927_v2 = vshrl.u32 %v732_v43, 16  ;;  %v930_v3 = vshll.u32 %v732_v43, 16  ;;  %v1040_v7 = vld [vmem:[%s3213_s26 + $0x50] sm:$0x3] }
  0x8e   : > { %v2917_v8 = vld [vmem:[#allocation4 + $0xd4] ss:$20 sps:$4 sm:$0xff]   ;;  %1161 = vrot.lane.b32.xlu1 %v2689_v56, %s3096_s27  ;;  %v914_v10 = vor.u32 %v913_v59, %v910_v58  ;;  %v435_v11 = vshrl.u32 %v281_v48, 16  ;;  %v438_v12 = vshll.u32 %v281_v48, 16  ;;  %v444_v13 = vshll.u32 %v282_v54, 16 }
  0x8f   : > { %v2916_v14 = vld [vmem:[#allocation4 + $0xc8] ss:$20 sps:$4 sm:$0xff]   ;;  %v922_v15 = vrot.slane %v920_v1, 6  ;;  %v929_v16 = vrot.slane %v927_v2, 5  ;;  %v932_v17 = vrot.slane %v930_v3, 6  ;;  %v448_v18 = vshrl.u32 %v282_v54, 16  ;;  %1828 = vmatprep.subr.bf16.mxu1 %v2917_v8 }
  0x90   : > { %v560_v19 = vld [vmem:[%s3213_s26 + $0x54] sm:$0xe]  ;;  %v2919_v20 = vld [vmem:[#allocation4 + $0xd0] ss:$20 sps:$4 sm:$0xff]   ;;  %v915_v21 = vrot.slane %v914_v10, 4  ;;  %v437_v22 = vrot.slane %v435_v11, 4  ;;  %1716 = vmatpush1.bf16.msra.mxu0 %v2916_v14 }
  0x91   : > { %v440_v23 = vrot.slane %v438_v12, 5  ;;  %v446_v24 = vrot.slane %v444_v13, 5  ;;  %v561_v25 = vld [vmem:[%s3213_s26 + $0x58] sm:$0xf]  ;;  %v2920_v26 = vld [vmem:[#allocation4 + $0xf4] ss:$20 sps:$4 sm:$0xff]   ;;  %682 = vrot.lane.b32.xlu0 %v2666_v57, %s3097_s28  ;;  %v923_v27 = vor.u32 %v922_v15, %v919_v63  ;;  %v933_v28 = vor.u32 %v932_v17, %v929_v16  ;;  %1829 = vmatpush1.bf16.msra.mxu1 %v2919_v20 }
  0x92   : > { %v450_v29 = vrot.slane %v448_v18, 4  ;;  %v454_v30 = vshll.u32 %v283_v60, 16  ;;  %v562_v31 = vld [vmem:[%s3213_s26 + $0x5c] sm:$0x1]  ;;  %v2682_v34 = vrot.slane %v1038_v4, 10  ;;  %v1115_v35 = vrot.slane %v1039_v6, 6  ;;  %1717 = vmatprep.subr.bf16.mxu0 %v2920_v26 }
  0x93   : > { %v2923_v32 = vld [vmem:[#allocation4 + $0xfc] ss:$20 sps:$4 sm:$0xff]   ;;  %v441_v33 = vor.u32 %v440_v23, %v437_v22  ;;  %v1118_v36 = vrot.slane %v1040_v7, 6  ;;  %v733_v37 = vld [vmem:[%s3213_s26 + $0x54] sm:$0xe]  ;;  %v924_v38 = vsel %vm3243_vm10, %v915_v21, %v923_v27  ;;  %v925_v39 = vrot.slane %v923_v27, 4 }
  0x94   : > { %v451_v40 = vor.u32 %v450_v29, %v446_v24  ;;  %v456_v41 = vrot.slane %v454_v30, 5  ;;  %v734_v43 = vld [vmem:[%s3213_s26 + $0x58] sm:$0xf]  ;;  %v2922_v44 = vld [vmem:[#allocation4 + $0xf0] ss:$20 sps:$4 sm:$0xff]   ;;  %v1116_v47 = vsel %vm3206_vm2, %v2682_v34, %v1115_v35  ;;  %v1117_v48 = vrot.slane %v1115_v35, 4  ;;  %1830 = vmatprep.subr.bf16.mxu1 %v2923_v32 }
  0x95   : > { %v2925_v45 = vld [vmem:[#allocation4 + $0xf8] ss:$20 sps:$4 sm:$0xff]   ;;  %v442_v46 = vrot.slane %v441_v33, 4  ;;  %v2659_v49 = vrot.slane %v560_v19, 9  ;;  %v2926_v50 = vld [vmem:[#allocation4 + $0x11c] ss:$20 sps:$4 sm:$0xff]   ;;  %v934_v51 = vsel %vm3243_vm10, %v925_v39, %v933_v28  ;;  %1718 = vmatpush1.bf16.msra.mxu0 %v2922_v44 }
  0x96   : > { %v452_v52 = vrot.slane %v451_v40, 4  ;;  %v641_v53 = vrot.slane %v561_v25, 5  ;;  %v644_v54 = vrot.slane %v562_v31, 5  ;;  %v2929_v55 = vld [vmem:[#allocation4 + $0x124] ss:$20 sps:$4 sm:$0xff]   ;;  %v2674_v56 = vcombine.low %v924_v38, %v934_v51  ;;  %1831 = vmatpush1.bf16.msra.mxu1 %v2925_v45  ;;  %1719 = vmatprep.subr.bf16.mxu0 %v2926_v50 }
  0x97   : > { %v447_v57 = vsel %vm3258_vm11, %v442_v46, %v446_v24  ;;  %v1119_v58 = vsel %vm3206_vm2, %v1117_v48, %v1118_v36  ;;  %v735_v59 = vld [vmem:[%s3213_s26 + $0x5c] sm:$0x3]  ;;  %v936_v60 = vshrl.u32 %v733_v37, 16  ;;  %v284_v61 = vld [vmem:[%s3213_s26 + $0x54] sm:$0xf]  ;;  %v939_v10 = vshll.u32 %v733_v37, 16  ;;  %1832 = vmatprep.subr.bf16.mxu1 %v2929_v55 }
  0x98   : > { %v457_v62 = vsel %vm3258_vm11, %v452_v52, %v456_v41  ;;  %v2690_v63 = vcombine.low %v1116_v47, %v1119_v58  ;;  %v642_v1 = vsel %vm3219_vm7, %v2659_v49, %v641_v53  ;;  %v643_v2 = vrot.slane %v641_v53, 4  ;;  %v285_v3 = vld [vmem:[%s3213_s26 + $0x58] sm:$0xf]  ;;  %v2931_v6 = vld [vmem:[#allocation4 + $0x120] ss:$20 sps:$4 sm:$0xff]   ;;  %999 = vrot.lane.b32.xlu1 %v2674_v56, %s3098_s29 }
  0x99   : > { %v2928_v4 = vld [vmem:[#allocation4 + $0x118] ss:$20 sps:$4 sm:$0xff]   ;;  %v2650_v7 = vcombine.low %v447_v57, %v457_v62  ;;  %v938_v8 = vrot.slane %v936_v60, 5  ;;  %v945_v11 = vshrl.u32 %v734_v43, 16  ;;  %v286_v12 = vld [vmem:[%s3213_s26 + $0x5c] sm:$0x1] }
  0x9a   : > { %v2932_v13 = vld [vmem:[#allocation4 + $0x144] ss:$20 sps:$4 sm:$0xff]   ;;  %v645_v14 = vsel %vm3219_vm7, %v643_v2, %v644_v54  ;;  %v948_v15 = vshll.u32 %v734_v43, 16  ;;  %v955_v16 = vshrl.u32 %v735_v59, 16  ;;  %v958_v17 = vshll.u32 %v735_v59, 16  ;;  %1720 = vmatpush1.bf16.msra.mxu0 %v2928_v4  ;;  %1833 = vmatpush1.bf16.msra.mxu1 %v2931_v6 }
  0x9b   : > { %v1041_v18 = vld [vmem:[%s3213_s26 + $0x54] sm:$0xc]  ;;  %v2935_v19 = vld [vmem:[#allocation4 + $0x14c] ss:$20 sps:$4 sm:$0xff]   ;;  %518 = vrot.lane.b32.xlu0 %v2650_v7, %s3099_s30  ;;  %v2667_v20 = vcombine.low %v642_v1, %v645_v14  ;;  %v941_v21 = vrot.slane %v939_v10, 6  ;;  %v947_v22 = vrot.slane %v945_v11, 5  ;;  %1721 = vmatprep.subr.bf16.mxu0 %v2932_v13 }
  0x9c   : > { %v459_v23 = vshrl.u32 %v284_v61, 16  ;;  %v1042_v24 = vld [vmem:[%s3213_s26 + $0x58] sm:$0xf]  ;;  %v2934_v25 = vld [vmem:[#allocation4 + $0x140] ss:$20 sps:$4 sm:$0xff]   ;;  %v950_v26 = vrot.slane %v948_v15, 6  ;;  %1163 = vrot.lane.b32.xlu1 %v2690_v63, %s3096_s27  ;;  %1834 = vmatprep.subr.bf16.mxu1 %v2935_v19 }
  0x9d   : > { %v957_v27 = vrot.slane %v955_v16, 5  ;;  %v960_v9 = vrot.slane %v958_v17, 6  ;;  %v462_v28 = vshll.u32 %v284_v61, 16  ;;  %v1043_v29 = vld [vmem:[%s3213_s26 + $0x5c] sm:$0x3]  ;;  %v942_v31 = vor.u32 %v941_v21, %v938_v8  ;;  %v2962_v41 = vld [vmem:[%s3213_s26] sm:$0xff]  }
  0x9e   : > { %v2937_v30 = vld [vmem:[#allocation4 + $0x148] ss:$20 sps:$4 sm:$0xff]   ;;  %v461_v32 = vrot.slane %v459_v23, 4  ;;  %v468_v33 = vshll.u32 %v285_v3, 16  ;;  %v472_v34 = vshrl.u32 %v285_v3, 16  ;;  %v951_v36 = vor.u32 %v950_v26, %v947_v22  ;;  %1722 = vmatpush1.bf16.msra.mxu0 %v2934_v25  ;;  %255 = vst.msk [vmem:[#allocation2] sm:$0xff] %vm254_vm12, %v2962_v41 }
  0x9f   : > { %v2938_v35 = vld [vmem:[#allocation4 + $0x16c] ss:$20 sps:$4 sm:$0xff]   ;;  %v961_v37 = vor.u32 %v960_v9, %v957_v27  ;;  %v464_v38 = vrot.slane %v462_v28, 5  ;;  %v478_v39 = vshll.u32 %v286_v12, 16  ;;  %v2941_v40 = vld [vmem:[#allocation4 + $0x174] ss:$20 sps:$4 sm:$0xff]   ;;  %684 = vrot.lane.b32.xlu0 %v2667_v20, %s3097_s28  ;;  %1835 = vmatpush1.bf16.msra.mxu1 %v2937_v30 }
  0xa0   : > { %v943_v43 = vrot.slane %v942_v31, 4  ;;  %v470_v44 = vrot.slane %v468_v33, 5  ;;  %v474_v45 = vrot.slane %v472_v34, 4  ;;  %v2683_v46 = vrot.slane %v1041_v18, 10  ;;  %v2940_v51 = vld [vmem:[#allocation4 + $0x168] ss:$20 sps:$4 sm:$0xff]   ;;  %1723 = vmatprep.subr.bf16.mxu0 %v2938_v35  ;;  %1836 = vmatprep.subr.bf16.mxu1 %v2941_v40 }
  0xa1   : > { %v953_v47 = vrot.slane %v951_v36, 4  ;;  %v465_v48 = vor.u32 %v464_v38, %v461_v32  ;;  %v480_v49 = vrot.slane %v478_v39, 5  ;;  %v1122_v50 = vrot.slane %v1042_v24, 6  ;;  %v2943_v55 = vld [vmem:[#allocation4 + $0x170] ss:$20 sps:$4 sm:$0xff]   ;;  %v2977_v16 = vld [vmem:[%s3213_s26 + $0x18] sm:$0xff]  }
  0xa2   : > { %v952_v52 = vsel %vm3243_vm10, %v943_v43, %v951_v36  ;;  %v475_v53 = vor.u32 %v474_v45, %v470_v44  ;;  %v1125_v54 = vrot.slane %v1043_v29, 6  ;;  %v2944_v60 = vld [vmem:[#allocation4 + $0x194] ss:$20 sps:$4 sm:$0xff]   ;;  %v2947_v61 = vld [vmem:[#allocation4 + $0x19c] ss:$20 sps:$4 sm:$0xff]   ;;  %1724 = vmatpush1.bf16.msra.mxu0 %v2940_v51  ;;  %257 = vst.msk [vmem:[#allocation2 + $0x20] sm:$0xff] %vm254_vm12, %v2977_v16 }
  0xa3   : > { %v962_v56 = vsel %vm3243_vm10, %v953_v47, %v961_v37  ;;  %v466_v57 = vrot.slane %v465_v48, 4  ;;  %v1123_v58 = vsel %vm3206_vm2, %v2683_v46, %v1122_v50  ;;  %v1124_v59 = vrot.slane %v1122_v50, 4  ;;  %v2949_v3 = vld [vmem:[#allocation4 + $0x198] ss:$20 sps:$4 sm:$0xff]   ;;  %1837 = vmatpush1.bf16.msra.mxu1 %v2943_v55  ;;  %v2950_v7 = vld [vmem:[#allocation4 + $0x1bc] ss:$20 sps:$4 sm:$0xff]   ;;  %1725 = vmatprep.subr.bf16.mxu0 %v2944_v60 }
  0xa4   : > { %v2675_v62 = vcombine.low %v952_v52, %v962_v56  ;;  %v476_v63 = vrot.slane %v475_v53, 4  ;;  %1838 = vmatprep.subr.bf16.mxu1 %v2947_v61  ;;  %v2953_v10 = vld [vmem:[#allocation4 + $0x1c4] ss:$20 sps:$4 sm:$0xff]   ;;  %v2958_v13 = vld [vmem:[#allocation4 + $0x1e0] ss:$20 sps:$4 sm:$0xff]   ;;  %v2989_v9 = vld [vmem:[%s3213_s26 + $0x48] sm:$0xff]  }
  0xa5   : > { %v471_v1 = vsel %vm3258_vm11, %v466_v57, %v470_v44  ;;  %v1126_v2 = vsel %vm3206_vm2, %v1124_v59, %v1125_v54  ;;  %v2952_v11 = vld [vmem:[#allocation4 + $0x1b8] ss:$20 sps:$4 sm:$0xff]   ;;  %v2961_v15 = vld [vmem:[#allocation4 + $0x1e8] ss:$20 sps:$4 sm:$0xff]   ;;  %v2968_v21 = vld [vmem:[#allocation4 + $0x210] ss:$20 sps:$4 sm:$0xff]  }
  0xa6   : > { %1001 = vrot.lane.b32.xlu1 %v2675_v62, %s3098_s29  ;;  %v481_v4 = vsel %vm3258_vm11, %v476_v63, %v480_v49  ;;  %v2691_v6 = vcombine.low %v1123_v58, %v1126_v2  ;;  %1726 = vmatpush1.bf16.msra.mxu0 %v2946_v42  ;;  %v2956_v12 = vld [vmem:[#allocation4 + $0x1e4] ss:$20 sps:$4 sm:$0xff]   ;;  %v2959_v14 = vld [vmem:[#allocation4 + $0x1ec] ss:$20 sps:$4 sm:$0xff]   ;;  %v2966_v18 = vld [vmem:[#allocation4 + $0x214] ss:$20 sps:$4 sm:$0xff]  }
  0xa7   : > { %v2651_v8 = vcombine.low %v471_v1, %v481_v4  ;;  %1839 = vmatpush1.bf16.msra.mxu1 %v2949_v3  ;;  %1727 = vmatprep.subr.bf16.mxu0 %v2950_v7  ;;  %v2963_v17 = vld [vmem:[#allocation4 + $0x20c] ss:$20 sps:$4 sm:$0xff]   ;;  %v2965_v19 = vld [vmem:[#allocation4 + $0x208] ss:$20 sps:$4 sm:$0xff]   ;;  %v2983_v23 = vld [vmem:[%s3213_s26 + $0x30] sm:$0xff]   ;;  %v3100_v29 = vmov 0  }
  0xa8   : > { %1840 = vmatprep.subr.bf16.mxu1 %v2953_v10  ;;  %v2980_v20 = vld [vmem:[%s3213_s26 + $0x24] sm:$0xff]   ;;  %v2972_v24 = vld [vmem:[#allocation4 + $0x23c] ss:$20 sps:$4 sm:$0xff]   ;;  %259 = vst.msk [vmem:[#allocation2 + $0x40] sm:$0xff] %vm254_vm12, %v2983_v23  ;;  %v2974_v27 = vld [vmem:[#allocation4 + $0x238] ss:$20 sps:$4 sm:$0xff]  }
  0xa9   : > { %520 = vrot.lane.b32.xlu0 %v2651_v8, %s3099_s30  ;;  %v2969_v22 = vld [vmem:[#allocation4 + $0x234] ss:$20 sps:$4 sm:$0xff]   ;;  %258 = vst.msk [vmem:[#allocation2 + $0x30] sm:$0xff] %vm254_vm12, %v2980_v20  ;;  %v2971_v25 = vld [vmem:[#allocation4 + $0x230] ss:$20 sps:$4 sm:$0xff]   ;;  %v2986_v26 = vld [vmem:[%s3213_s26 + $0x3c] sm:$0xff]  }
  0xaa   : > { %1165 = vrot.lane.b32.xlu1 %v2691_v6, %s3096_s27  ;;  %1728 = vmatpush1.bf16.msra.mxu0 %v2952_v11  ;;  %260 = vst.msk [vmem:[#allocation2 + $0x50] sm:$0xff] %vm254_vm12, %v2986_v26  ;;  %261 = vst.msk [vmem:[#allocation2 + $0x60] sm:$0xff] %vm254_vm12, %v2989_v9  ;;  %v2992_v30 = vld [vmem:[%s3213_s26 + $0x54] sm:$0xff]   ;;  %vm1680_vm2 = vcmask 916480   ;;  %v2976_v37 = vld [vmem:[#allocation4 + $0x10] ss:$20 sps:$4 sm:$0xff]  }
  0xab   : > { %1841 = vmatpush1.bf16.msra.mxu1 %v2955_v0  ;;  %1729 = vmatprep.subr.bf16.mxu0 %v2956_v12  ;;  %262 = vst.msk [vmem:[#allocation2 + $0x70] sm:$0xff] %vm254_vm12, %v2992_v30  ;;  %v2978_v41 = vld [vmem:[#allocation4 + $0x38] ss:$20 sps:$4 sm:$0xff]   ;;  %v2979_v44 = vld [vmem:[#allocation4 + $0x60] ss:$20 sps:$4 sm:$0xff]   ;;  %vm2468_vm7 = vcmask 1045509  }
  0xac   : > { %1842 = vmatprep.subr.bf16.mxu1 %v2959_v14  ;;  %v2981_v46 = vld [vmem:[#allocation4 + $0x88] ss:$20 sps:$4 sm:$0xff]   ;;  %v2982_v50 = vld [vmem:[#allocation4 + $0xb0] ss:$20 sps:$4 sm:$0xff]   ;;  %v2984_v53 = vld [vmem:[#allocation4 + $0xd8] ss:$20 sps:$4 sm:$0xff]  }
  0xad   : > { %v2985_v55 = vld [vmem:[#allocation4 + $0x100] ss:$20 sps:$4 sm:$0xff]   ;;  %v2987_v59 = vld [vmem:[#allocation4 + $0x128] ss:$20 sps:$4 sm:$0xff]   ;;  %v2988_v62 = vld [vmem:[#allocation4 + $0x150] ss:$20 sps:$4 sm:$0xff]  }
  0xae   : > { %1730 = vmatpush1.bf16.msra.mxu0 %v2958_v13  ;;  %v2990_v63 = vld [vmem:[#allocation4 + $0x178] ss:$20 sps:$4 sm:$0xff]   ;;  %v2991_v3 = vld [vmem:[#allocation4 + $0x1a0] ss:$20 sps:$4 sm:$0xff]   ;;  %v2993_v7 = vld [vmem:[#allocation4 + $0x1c8] ss:$20 sps:$4 sm:$0xff]  }
  0xaf   : > { %1843 = vmatpush1.bf16.msra.mxu1 %v2961_v15  ;;  %1731 = vmatprep.subr.bf16.mxu0 %v2963_v17  ;;  %v2994_v10 = vld [vmem:[#allocation4 + $0x1f0] ss:$20 sps:$4 sm:$0xff]   ;;  %v2995_v13 = vld [vmem:[#allocation4 + $0x218] ss:$20 sps:$4 sm:$0xff]   ;;  %v2996_v16 = vld [vmem:[#allocation4 + $0x240] ss:$20 sps:$4 sm:$0xff]  }
  0xb0   : > { %1844 = vmatprep.subr.bf16.mxu1 %v2966_v18  ;;  %s3031_s26 = scalar_lea.vmem %s3030_s25, 1280 }
  0xb1   : > { %p3033_p3 = scmp.lt.s32.totalorder %s3031_s26, %s3025_s20 }
  0xb2   : > { %1732 = vmatpush1.bf16.msra.mxu0 %v2965_v19 }
  0xb3   : > { %1845 = vmatpush1.bf16.msra.mxu1 %v2968_v21  ;;  %1733 = vmatprep.subr.bf16.mxu0 %v2969_v22  ;;  %p3034_p4 = por %p3033_p3, %p3032_p2 }
  0xb4   : > { %1846 = vmatprep.subr.bf16.mxu1 %v2972_v24 }
  0xb5   : > { %v1152_v31 = vpop.permute.xlu1 %1151  ;;  %p3035_p7 = pnand %p3034_p4, %p3028_p12 }
  0xb6   : > { %1734 = vmatpush1.bf16.msra.mxu0 %v2971_v25 }
  0xb7   : > { %v671_v28 = vpop.permute.xlu0 %670  ;;  %1847 = vmatpush1.bf16.msra.mxu1 %v2974_v27  ;;  %1931 = vmatprep.subr.bf16.mxu0 %v3100_v29 }
  0xb8   : > { %697 = vst.msk [vmem:[#allocation2 + $0x8] sm:$0xff] %vm696_vm13, %v671_v28  ;;  %2794 = vmatprep.subr.bf16.mxu1 %v3100_v29 }
  0xbe   : > { %v988_v32 = vpop.permute.xlu0 %987 }
  0xbf   : > { %1012 = vst.msk [vmem:[#allocation2 + $0x8] sm:$0xff] %vm1011_vm14, %v988_v32 }
  0xc0   : > { %1176 = vst.msk [vmem:[#allocation2 + $0x8] sm:$0xff] %vm1175_vm15, %v1152_v31 }
  0xc2   : > { %v507_v33 = vpop.permute.xlu1 %506  ;;  %v673_v34 = vpop.permute.xlu0 %672 }
  0xc3   : > { %531 = vst.msk [vmem:[#allocation2] sm:$0xff] %vm530_vm0, %v507_v33 }
  0xc4   : > { %699 = vst.msk [vmem:[#allocation2 + $0x18] sm:$0xff] %vm696_vm13, %v673_v34 }
  0xc5   : > { %695 = vst.msk [vmem:[#allocation2] sm:$0xff] %vm694_vm1, %v671_v28 }
  0xc7   : > { %v3518_v35 = vld [vmem:[#allocation2 + $0x8] sm:$0xff] }
  0xc8   : > { %2767 = vmatprep.mubr.msk.bf16.mxu0 %vm1680_vm2, %v3518_v35  ;;  %2775 = vmatprep.mubr.msk.bf16.mxu1 %vm1680_vm2, %v3518_v35 }
  0xc9   : > { %v990_v36 = vpop.permute.xlu1 %989 }
  0xca   : > { %1013 = vst.msk [vmem:[#allocation2 + $0x18] sm:$0xff] %vm1011_vm14, %v990_v36 }
  0xcc   : > { %v3525_v38 = vld [vmem:[#allocation2] sm:$0xff] }
  0xcd   : > { %1738 = vmatmul.mubr.bf16.vlgmr.msra.gmra.mrb[0].mxu0 %v3525_v38  ;;  %1851 = vmatmul.mubr.bf16.vlgmr.msra.gmra.mrb[0].mxu1 %v3525_v38  ;;  %v509_v39 = vpop.permute.xlu0 %508  ;;  %v1154_v40 = vpop.permute.xlu1 %1153 }
  0xce   : > { %1932 = vmatpush1.bf16.msra.mxu0 %v2976_v37  ;;  %2809 = vmatpush1.bf16.msra.mxu1 %v2976_v37  ;;  %532 = vst.msk [vmem:[#allocation2 + $0x10] sm:$0xff] %vm530_vm0, %v509_v39  ;;  %v2310_v39 = vlaneseq }
  0xcf   : > { %1177 = vst.msk [vmem:[#allocation2 + $0x18] sm:$0xff] %vm1175_vm15, %v1154_v40  ;;  %1933 = vmatprep.subr.bf16.mxu0 %v3100_v29  ;;  %2795 = vmatprep.subr.bf16.mxu1 %v3100_v29 }
  0xd0   : > { %698 = vst.msk [vmem:[#allocation2 + $0x10] sm:$0xff] %vm694_vm1, %v673_v34 }
  0xd1   : > { %v675_v43 = vpop.permute.xlu0 %674 }
  0xd2   : > { %1934 = vmatpush1.bf16.msra.mxu0 %v2978_v41  ;;  %2810 = vmatpush1.bf16.msra.mxu1 %v2978_v41  ;;  %701 = vst.msk [vmem:[#allocation2 + $0x28] sm:$0xff] %vm696_vm13, %v675_v43 }
  0xd3   : > { %1935 = vmatprep.subr.bf16.mxu0 %v3100_v29  ;;  %2796 = vmatprep.subr.bf16.mxu1 %v3100_v29 }
  0xd6   : > { %v3537_v45 = vld [vmem:[#allocation2 + $0x18] sm:$0xff]  ;;  %1936 = vmatpush1.bf16.msra.mxu0 %v2979_v44  ;;  %2811 = vmatpush1.bf16.msra.mxu1 %v2979_v44 }
  0xd7   : > { %2768 = vmatprep.mubr.msk.bf16.mxu0 %vm1680_vm2, %v3537_v45  ;;  %2776 = vmatprep.mubr.msk.bf16.mxu1 %vm1680_vm2, %v3537_v45  ;;  %v3543_v47 = vld [vmem:[#allocation2 + $0x10] sm:$0xff]  ;;  %v992_v48 = vpop.permute.xlu1 %991 }
  0xd8   : > { %1748 = vmatmul.mubr.bf16.gmra.mrb[4].mxu0 %v3543_v47  ;;  %1861 = vmatmul.mubr.bf16.gmra.mrb[4].mxu1 %v3543_v47  ;;  %1014 = vst.msk [vmem:[#allocation2 + $0x28] sm:$0xff] %vm1011_vm14, %v992_v48 }
  0xd9   : > { %1937 = vmatprep.subr.bf16.mxu0 %v3100_v29  ;;  %2797 = vmatprep.subr.bf16.mxu1 %v3100_v29  ;;  %v511_v49 = vpop.permute.xlu0 %510 }
  0xda   : > { %1938 = vmatpush1.bf16.msra.mxu0 %v2981_v46  ;;  %2812 = vmatpush1.bf16.msra.mxu1 %v2981_v46  ;;  %533 = vst.msk [vmem:[#allocation2 + $0x20] sm:$0xff] %vm530_vm0, %v511_v49  ;;  %v3644_v49 = vshrl.u32 %v2310_v39, 7 }
  0xdb   : > { %1939 = vmatprep.subr.bf16.mxu0 %v3100_v29  ;;  %2798 = vmatprep.subr.bf16.mxu1 %v3100_v29  ;;  %700 = vst.msk [vmem:[#allocation2 + $0x20] sm:$0xff] %vm694_vm1, %v675_v43  ;;  %v1156_v51 = vpop.permute.xlu1 %1155 }
  0xdc   : > { %1178 = vst.msk [vmem:[#allocation2 + $0x28] sm:$0xff] %vm1175_vm15, %v1156_v51 }
  0xdd   : > { %v677_v52 = vpop.permute.xlu0 %676 }
  0xde   : > { %1940 = vmatpush1.bf16.msra.mxu0 %v2982_v50  ;;  %2813 = vmatpush1.bf16.msra.mxu1 %v2982_v50  ;;  %703 = vst.msk [vmem:[#allocation2 + $0x38] sm:$0xff] %vm696_vm13, %v677_v52 }
  0xdf   : > { %1941 = vmatprep.subr.bf16.mxu0 %v3100_v29  ;;  %2799 = vmatprep.subr.bf16.mxu1 %v3100_v29 }
  0xe2   : > { %1942 = vmatpush1.bf16.msra.mxu0 %v2984_v53  ;;  %2814 = vmatpush1.bf16.msra.mxu1 %v2984_v53  ;;  %v3558_v54 = vld [vmem:[#allocation2 + $0x20] sm:$0xff] }
  0xe3   : > { %1943 = vmatprep.subr.bf16.mxu0 %v3100_v29  ;;  %2800 = vmatprep.subr.bf16.mxu1 %v3100_v29  ;;  %v994_v56 = vpop.permute.xlu1 %993  ;;  %v3562_v57 = vld [vmem:[#allocation2 + $0x28] sm:$0xff] }
  0xe4   : > { %1015 = vst.msk [vmem:[#allocation2 + $0x38] sm:$0xff] %vm1011_vm14, %v994_v56  ;;  %2769 = vmatprep.mubr.msk.bf16.mxu0 %vm1680_vm2, %v3562_v57  ;;  %2777 = vmatprep.mubr.msk.bf16.mxu1 %vm1680_vm2, %v3562_v57 }
  0xe5   : > { %1758 = vmatmul.mubr.bf16.gmra.mrb[8].mxu0 %v3558_v54  ;;  %1871 = vmatmul.mubr.bf16.gmra.mrb[8].mxu1 %v3558_v54 }
  0xe6   : > { %v513_v58 = vpop.permute.xlu0 %512  ;;  %1944 = vmatpush1.bf16.msra.mxu0 %v2985_v55  ;;  %2815 = vmatpush1.bf16.msra.mxu1 %v2985_v55 }
  0xe7   : > { %534 = vst.msk [vmem:[#allocation2 + $0x30] sm:$0xff] %vm530_vm0, %v513_v58  ;;  %v1158_v60 = vpop.permute.xlu1 %1157  ;;  %1945 = vmatprep.subr.bf16.mxu0 %v3100_v29  ;;  %2801 = vmatprep.subr.bf16.mxu1 %v3100_v29 }
  0xe8   : > { %702 = vst.msk [vmem:[#allocation2 + $0x30] sm:$0xff] %vm694_vm1, %v677_v52 }
  0xe9   : > { %1179 = vst.msk [vmem:[#allocation2 + $0x38] sm:$0xff] %vm1175_vm15, %v1158_v60  ;;  %v2312_v60 = vsub.s32 0, %v3644_v49 }
  0xea   : > { %v679_v61 = vpop.permute.xlu0 %678  ;;  %1946 = vmatpush1.bf16.msra.mxu0 %v2987_v59  ;;  %2816 = vmatpush1.bf16.msra.mxu1 %v2987_v59 }
  0xeb   : > { %705 = vst.msk [vmem:[#allocation2 + $0x48] sm:$0xff] %vm696_vm13, %v679_v61  ;;  %1947 = vmatprep.subr.bf16.mxu0 %v3100_v29  ;;  %2802 = vmatprep.subr.bf16.mxu1 %v3100_v29 }
  0xee   : > { %1948 = vmatpush1.bf16.msra.mxu0 %v2988_v62  ;;  %2817 = vmatpush1.bf16.msra.mxu1 %v2988_v62 }
  0xef   : > { %v3581_v2 = vld [vmem:[#allocation2 + $0x30] sm:$0xff]  ;;  %1949 = vmatprep.subr.bf16.mxu0 %v3100_v29  ;;  %2803 = vmatprep.subr.bf16.mxu1 %v3100_v29 }
  0xf0   : > { %v3579_v1 = vld [vmem:[#allocation2 + $0x38] sm:$0xff]  ;;  %v996_v42 = vpop.permute.xlu1 %995 }
  0xf1   : > { %2770 = vmatprep.mubr.msk.bf16.mxu0 %vm1680_vm2, %v3579_v1  ;;  %2778 = vmatprep.mubr.msk.bf16.mxu1 %vm1680_vm2, %v3579_v1  ;;  %1016 = vst.msk [vmem:[#allocation2 + $0x48] sm:$0xff] %vm1011_vm14, %v996_v42  ;;  %v3651_v42 = vld [vmem:[%s3809_s2] sm:$0x1f] }
  0xf2   : > { %1768 = vmatmul.mubr.bf16.gmra.mrb[12].mxu0 %v3581_v2  ;;  %1881 = vmatmul.mubr.bf16.gmra.mrb[12].mxu1 %v3581_v2 }
  0xf3   : > { %1950 = vmatpush1.bf16.msra.mxu0 %v2990_v63  ;;  %2818 = vmatpush1.bf16.msra.mxu1 %v2990_v63  ;;  %v515_v4 = vpop.permute.xlu0 %514 }
  0xf4   : > { %1951 = vmatprep.subr.bf16.mxu0 %v3100_v29  ;;  %2804 = vmatprep.subr.bf16.mxu1 %v3100_v29  ;;  %535 = vst.msk [vmem:[#allocation2 + $0x40] sm:$0xff] %vm530_vm0, %v515_v4  ;;  %v1160_v6 = vpop.permute.xlu1 %1159  ;;  %v2324_v4 = vsub.s32 3, %v3644_v49 }
  0xf5   : > { %704 = vst.msk [vmem:[#allocation2 + $0x40] sm:$0xff] %vm694_vm1, %v679_v61  ;;  %v2320_v61 = vsub.s32 2, %v3644_v49 }
  0xf6   : > { %1180 = vst.msk [vmem:[#allocation2 + $0x48] sm:$0xff] %vm1175_vm15, %v1160_v6 }
  0xf7   : > { %1952 = vmatpush1.bf16.msra.mxu0 %v2991_v3  ;;  %2819 = vmatpush1.bf16.msra.mxu1 %v2991_v3  ;;  %v681_v8 = vpop.permute.xlu0 %680  ;;  %v2316_v3 = vsub.s32 1, %v3644_v49 }
  0xf8   : > { %1953 = vmatprep.subr.bf16.mxu0 %v3100_v29  ;;  %2805 = vmatprep.subr.bf16.mxu1 %v3100_v29  ;;  %707 = vst.msk [vmem:[#allocation2 + $0x58] sm:$0xff] %vm696_vm13, %v681_v8 }
  0xfb   : > { %1954 = vmatpush1.bf16.msra.mxu0 %v2993_v7  ;;  %2820 = vmatpush1.bf16.msra.mxu1 %v2993_v7 }
  0xfc   : > { %1955 = vmatprep.subr.bf16.mxu0 %v3100_v29  ;;  %2806 = vmatprep.subr.bf16.mxu1 %v3100_v29  ;;  %v998_v11 = vpop.permute.xlu1 %997  ;;  %v1192_v12 = vld [vmem:[#allocation2 + $0x40] sm:$0xff] }
  0xfd   : > { %v1193_v0 = vld [vmem:[#allocation2 + $0x48] sm:$0xff]  ;;  %1017 = vst.msk [vmem:[#allocation2 + $0x58] sm:$0xff] %vm1011_vm14, %v998_v11 }
  0xfe   : > { %2771 = vmatprep.mubr.msk.bf16.mxu0 %vm1680_vm2, %v1193_v0  ;;  %2779 = vmatprep.mubr.msk.bf16.mxu1 %vm1680_vm2, %v1193_v0 }
  0xff   : > { %1778 = vmatmul.mubr.bf16.gmra.mrb[16].mxu0 %v1192_v12  ;;  %1891 = vmatmul.mubr.bf16.gmra.mrb[16].mxu1 %v1192_v12  ;;  %v517_v5 = vpop.permute.xlu0 %516 }
 0x100   : > { %1956 = vmatpush1.bf16.msra.mxu0 %v2994_v10  ;;  %2821 = vmatpush1.bf16.msra.mxu1 %v2994_v10  ;;  %536 = vst.msk [vmem:[#allocation2 + $0x50] sm:$0xff] %vm530_vm0, %v517_v5  ;;  %v1162_v14 = vpop.permute.xlu1 %1161 }
 0x101   : > { %1957 = vmatprep.subr.bf16.mxu0 %v3100_v29  ;;  %2807 = vmatprep.subr.bf16.mxu1 %v3100_v29  ;;  %706 = vst.msk [vmem:[#allocation2 + $0x50] sm:$0xff] %vm694_vm1, %v681_v8 }
 0x102   : > { %1181 = vst.msk [vmem:[#allocation2 + $0x58] sm:$0xff] %vm1175_vm15, %v1162_v14 }
 0x103   : > { %v683_v15 = vpop.permute.xlu0 %682 }
 0x104   : > { %1958 = vmatpush1.bf16.msra.mxu0 %v2995_v13  ;;  %2822 = vmatpush1.bf16.msra.mxu1 %v2995_v13  ;;  %709 = vst.msk [vmem:[#allocation2 + $0x68] sm:$0xff] %vm696_vm13, %v683_v15 }
 0x105   : > { %1959 = vmatprep.subr.bf16.mxu0 %v3100_v29  ;;  %2808 = vmatprep.subr.bf16.mxu1 %v3100_v29 }
 0x108   : > { %1960 = vmatpush1.bf16.msra.mxu0 %v2996_v16  ;;  %2823 = vmatpush1.bf16.msra.mxu1 %v2996_v16  ;;  %v1194_v18 = vld [vmem:[#allocation2 + $0x50] sm:$0xff] }
 0x109   : > { %v1195_v17 = vld [vmem:[#allocation2 + $0x58] sm:$0xff] }
 0x10a   : > { %2772 = vmatprep.mubr.msk.bf16.mxu0 %vm1680_vm2, %v1195_v17  ;;  %2780 = vmatprep.mubr.msk.bf16.mxu1 %vm1680_vm2, %v1195_v17  ;;  %v1000_v19 = vpop.permute.xlu1 %999 }
 0x10b   : > { %1788 = vmatmul.mubr.bf16.gmra.mrb[20].mxu0 %v1194_v18  ;;  %1901 = vmatmul.mubr.bf16.gmra.mrb[20].mxu1 %v1194_v18  ;;  %1018 = vst.msk [vmem:[#allocation2 + $0x68] sm:$0xff] %vm1011_vm14, %v1000_v19 }
 0x10d   : > { %v519_v20 = vpop.permute.xlu0 %518 }
 0x10e   : > { %537 = vst.msk [vmem:[#allocation2 + $0x60] sm:$0xff] %vm530_vm0, %v519_v20  ;;  %v1164_v21 = vpop.permute.xlu1 %1163 }
 0x10f   : > { %708 = vst.msk [vmem:[#allocation2 + $0x60] sm:$0xff] %vm694_vm1, %v683_v15 }
 0x110   : > { %1182 = vst.msk [vmem:[#allocation2 + $0x68] sm:$0xff] %vm1175_vm15, %v1164_v21  ;;  %v3662_v21 = vrot.slane %v3651_v42, %v2316_v3 }
 0x111   : > { %v685_v22 = vpop.permute.xlu0 %684 }
 0x112   : > { %711 = vst.msk [vmem:[#allocation2 + $0x78] sm:$0xff] %vm696_vm13, %v685_v22 }
 0x116   : > { %v1196_v23 = vld [vmem:[#allocation2 + $0x60] sm:$0xff] }
 0x117   : > { %v1197_v25 = vld [vmem:[#allocation2 + $0x68] sm:$0xff] }
 0x118   : > { %v1002_v24 = vpop.permute.xlu1 %1001  ;;  %2773 = vmatprep.mubr.msk.bf16.mxu0 %vm1680_vm2, %v1197_v25  ;;  %2781 = vmatprep.mubr.msk.bf16.mxu1 %vm1680_vm2, %v1197_v25 }
 0x119   : > { %1019 = vst.msk [vmem:[#allocation2 + $0x78] sm:$0xff] %vm1011_vm14, %v1002_v24  ;;  %1798 = vmatmul.mubr.bf16.gmra.mrb[24].mxu0 %v1196_v23  ;;  %1911 = vmatmul.mubr.bf16.gmra.mrb[24].mxu1 %v1196_v23 }
 0x11b   : > { %v521_v26 = vpop.permute.xlu0 %520 }
 0x11c   : > { %538 = vst.msk [vmem:[#allocation2 + $0x70] sm:$0xff] %vm530_vm0, %v521_v26  ;;  %v1166_v27 = vpop.permute.xlu1 %1165 }
 0x11d   : > { %710 = vst.msk [vmem:[#allocation2 + $0x70] sm:$0xff] %vm694_vm1, %v685_v22  ;;  %v3665_v22 = vrot.slane %v3651_v42, %v2324_v4 }
 0x11e   : > { %1183 = vst.msk [vmem:[#allocation2 + $0x78] sm:$0xff] %vm1175_vm15, %v1166_v27 }
 0x124   : > { %v1198_v28 = vld [vmem:[#allocation2 + $0x70] sm:$0xff] }
 0x125   : > { %v1199_v9 = vld [vmem:[#allocation2 + $0x78] sm:$0xff] }
 0x126   : > { %2774 = vmatprep.mubr.msk.bf16.mxu0 %vm1680_vm2, %v1199_v9  ;;  %2782 = vmatprep.mubr.msk.bf16.mxu1 %vm1680_vm2, %v1199_v9 }
 0x127   : > { %1808 = vmatmul.mubr.bf16.gmra.mrb[28].mxu0 %v1198_v28  ;;  %1921 = vmatmul.mubr.bf16.gmra.mrb[28].mxu1 %v1198_v28 }
 0x128   : > { %2783 = vmatprep.mubr.msk.bf16.mxu0 %vm1680_vm2, %v3518_v35  ;;  %2787 = vmatprep.mubr.msk.bf16.mxu1 %vm1680_vm2, %v1193_v0 }
 0x12f   : > { %1964 = vmatmul.mubr.bf16.vlgmr.msra.gmra.mrb[32].mxu0 %v3525_v38  ;;  %1996 = vmatmul.mubr.bf16.vlgmr.msra.gmra.mrb[32].mxu1 %v1192_v12 }
 0x130   : > { %2784 = vmatprep.mubr.msk.bf16.mxu0 %vm1680_vm2, %v3537_v45  ;;  %2788 = vmatprep.mubr.msk.bf16.mxu1 %vm1680_vm2, %v1195_v17  ;;  %v3656_v17 = vrot.slane %v3651_v42, %v2312_v60 }
 0x137   : > { %1972 = vmatmul.mubr.bf16.gmra.mrb[36].mxu0 %v3543_v47  ;;  %2004 = vmatmul.mubr.bf16.gmra.mrb[36].mxu1 %v1194_v18  ;;  %v3659_v18 = vrot.slane %v3651_v42, %v2320_v61 }
 0x138   : > { %2785 = vmatprep.mubr.msk.bf16.mxu0 %vm1680_vm2, %v3562_v57  ;;  %2789 = vmatprep.mubr.msk.bf16.mxu1 %vm1680_vm2, %v1197_v25 }
 0x13f   : > { %1980 = vmatmul.mubr.bf16.gmra.mrb[40].mxu0 %v3558_v54  ;;  %2012 = vmatmul.mubr.bf16.gmra.mrb[40].mxu1 %v1196_v23 }
 0x140   : > { %2786 = vmatprep.mubr.msk.bf16.mxu0 %vm1680_vm2, %v3579_v1  ;;  %2790 = vmatprep.mubr.msk.bf16.mxu1 %vm1680_vm2, %v1199_v9 }
 0x147   : > { %1988 = vmatmul.mubr.bf16.gmra.mrb[44].mxu0 %v3581_v2  ;;  %2020 = vmatmul.mubr.bf16.gmra.mrb[44].mxu1 %v1198_v28 }
 0x1a0   : > { %v1739_v29 = vpop.f32.mrb[0].mxu0  ;;  %v1852_v30 = vpop.f32.mrb[0].mxu1 }
 0x1a1   : > { %v1741_v31 = vpop.f32.mrb[1].mxu0  ;;  %v1854_v32 = vpop.f32.mrb[1].mxu1 }
 0x1a2   : > { %v1743_v33 = vpop.f32.mrb[2].mxu0  ;;  %v1856_v34 = vpop.f32.mrb[2].mxu1 }
 0x1a3   : > { %v2028_v35 = vmax.f32 %v1739_v29, %v1743_v33  ;;  %v2042_v36 = vmax.f32 %v1852_v30, %v1856_v34  ;;  %v1745_v37 = vpop.f32.mrb[3].mxu0  ;;  %v1858_v38 = vpop.f32.mrb[3].mxu1 }
 0x1a4   : > { %v2035_v40 = vmax.f32 %v1741_v31, %v1745_v37  ;;  %v2049_v41 = vmax.f32 %v1854_v32, %v1858_v38 }
 0x1a5   : > { %v2029_v43 = vrot.slane %v2028_v35, 4  ;;  %v2043_v44 = vrot.slane %v2042_v36, 4 }
 0x1a6   : > { %v2036_v45 = vrot.slane %v2035_v40, 4  ;;  %v2050_v46 = vrot.slane %v2049_v41, 4 }
 0x1a7   : > { %v2030_v47 = vmax.f32 %v2028_v35, %v2029_v43  ;;  %v2044_v48 = vmax.f32 %v2042_v36, %v2043_v44 }
 0x1a8   : > { %v2037_v50 = vmax.f32 %v2035_v40, %v2036_v45  ;;  %v2051_v51 = vmax.f32 %v2049_v41, %v2050_v46 }
 0x1a9   : > { %v2031_v52 = vrot.slane %v2030_v47, 2  ;;  %v2045_v53 = vrot.slane %v2044_v48, 2 }
 0x1aa   : > { %v2038_v54 = vrot.slane %v2037_v50, 2  ;;  %v2052_v55 = vrot.slane %v2051_v51, 2 }
 0x1ab   : > { %v2032_v56 = vmax.f32 %v2030_v47, %v2031_v52  ;;  %v2046_v57 = vmax.f32 %v2044_v48, %v2045_v53  ;;  %v1749_v58 = vpop.f32.mrb[4].mxu0  ;;  %v1862_v59 = vpop.f32.mrb[4].mxu1 }
 0x1ac   : > { %v2039_v62 = vmax.f32 %v2037_v50, %v2038_v54  ;;  %v2053_v63 = vmax.f32 %v2051_v51, %v2052_v55  ;;  %v1751_v1 = vpop.f32.mrb[5].mxu0  ;;  %v1864_v2 = vpop.f32.mrb[5].mxu1 }
 0x1ad   : > { %v1753_v6 = vpop.f32.mrb[6].mxu0  ;;  %v1866_v7 = vpop.f32.mrb[6].mxu1  ;;  %v2033_v8 = vrot.slane %v2032_v56, 1  ;;  %v2047_v10 = vrot.slane %v2046_v57, 1 }
 0x1ae   : > { %v2063_v11 = vmax.f32 %v1749_v58, %v1753_v6  ;;  %v2077_v0 = vmax.f32 %v1862_v59, %v1866_v7  ;;  %v1755_v12 = vpop.f32.mrb[7].mxu0  ;;  %v1868_v5 = vpop.f32.mrb[7].mxu1  ;;  %v2040_v13 = vrot.slane %v2039_v62, 1  ;;  %v2054_v14 = vrot.slane %v2053_v63, 1 }
 0x1af   : > { %v2070_v15 = vmax.f32 %v1751_v1, %v1755_v12  ;;  %v2084_v16 = vmax.f32 %v1864_v2, %v1868_v5  ;;  %v2034_v25 = vmax.f32 %v2032_v56, %v2033_v8  ;;  %v2048_v26 = vmax.f32 %v2046_v57, %v2047_v10 }
 0x1b0   : > { %v2064_v19 = vrot.slane %v2063_v11, 4  ;;  %v2078_v20 = vrot.slane %v2077_v0, 4  ;;  %v2041_v28 = vmax.f32 %v2039_v62, %v2040_v13  ;;  %v2055_v29 = vmax.f32 %v2053_v63, %v2054_v14 }
 0x1b1   : > { %v2071_v23 = vrot.slane %v2070_v15, 4  ;;  %v2085_v24 = vrot.slane %v2084_v16, 4  ;;  %v2335_v36 = vadd.f32 %v3656_v17, %v2034_v25  ;;  %v2337_v37 = vadd.f32 %v3659_v18, %v2048_v26 }
 0x1b2   : > { %v2065_v27 = vmax.f32 %v2063_v11, %v2064_v19  ;;  %v2079_v9 = vmax.f32 %v2077_v0, %v2078_v20  ;;  %v2336_v40 = vadd.f32 %v3662_v21, %v2041_v28  ;;  %v2338_v41 = vadd.f32 %v3665_v22, %v2055_v29 }
 0x1b3   : > { %v2072_v30 = vmax.f32 %v2070_v15, %v2071_v23  ;;  %v2086_v31 = vmax.f32 %v2084_v16, %v2085_v24  ;;  %v2375_v52 = vmax.f32 %v2335_v36, 0.0  ;;  %v2377_v53 = vmax.f32 %v2337_v37, 0.0 }
 0x1b4   : > { %v2066_v32 = vrot.slane %v2065_v27, 2  ;;  %v2080_v33 = vrot.slane %v2079_v9, 2  ;;  %v2376_v58 = vmax.f32 %v2336_v40, 0.0  ;;  %v2378_v59 = vmax.f32 %v2338_v41, 0.0 }
 0x1b5   : > { %v2073_v34 = vrot.slane %v2072_v30, 2  ;;  %v2087_v35 = vrot.slane %v2086_v31, 2 }
 0x1b6   : > { %v2067_v38 = vmax.f32 %v2065_v27, %v2066_v32  ;;  %v2081_v39 = vmax.f32 %v2079_v9, %v2080_v33 }
 0x1b7   : > { %v2074_v43 = vmax.f32 %v2072_v30, %v2073_v34  ;;  %v2088_v44 = vmax.f32 %v2086_v31, %v2087_v35 }
 0x1b8   : > { %v2068_v45 = vrot.slane %v2067_v38, 1  ;;  %v2082_v46 = vrot.slane %v2081_v39, 1  ;;  %v1759_v50 = vpop.f32.mrb[8].mxu0  ;;  %v1872_v51 = vpop.f32.mrb[8].mxu1 }
 0x1b9   : > { %v2075_v47 = vrot.slane %v2074_v43, 1  ;;  %v2089_v48 = vrot.slane %v2088_v44, 1  ;;  %v1761_v56 = vpop.f32.mrb[9].mxu0  ;;  %v1874_v57 = vpop.f32.mrb[9].mxu1 }
 0x1ba   : > { %v2069_v54 = vmax.f32 %v2067_v38, %v2068_v45  ;;  %v2083_v55 = vmax.f32 %v2081_v39, %v2082_v46  ;;  %v1763_v62 = vpop.f32.mrb[10].mxu0  ;;  %v1876_v63 = vpop.f32.mrb[10].mxu1 }
 0x1bb   : > { %v2076_v60 = vmax.f32 %v2074_v43, %v2075_v47  ;;  %v2090_v61 = vmax.f32 %v2088_v44, %v2089_v48  ;;  %v2098_v3 = vmax.f32 %v1759_v50, %v1763_v62  ;;  %v2112_v4 = vmax.f32 %v1872_v51, %v1876_v63  ;;  %v1765_v6 = vpop.f32.mrb[11].mxu0  ;;  %v1878_v7 = vpop.f32.mrb[11].mxu1 }
 0x1bc   : > { %v2340_v1 = vadd.f32 %v3656_v17, %v2069_v54  ;;  %v2342_v2 = vadd.f32 %v3659_v18, %v2083_v55  ;;  %v2105_v11 = vmax.f32 %v1761_v56, %v1765_v6  ;;  %v2119_v0 = vmax.f32 %v1874_v57, %v1878_v7 }
 0x1bd   : > { %v2341_v8 = vadd.f32 %v3662_v21, %v2076_v60  ;;  %v2343_v10 = vadd.f32 %v3665_v22, %v2090_v61  ;;  %v2099_v13 = vrot.slane %v2098_v3, 4  ;;  %v2113_v14 = vrot.slane %v2112_v4, 4 }
 0x1be   : > { %v2380_v12 = vmax.f32 %v2340_v1, 0.0  ;;  %v2382_v5 = vmax.f32 %v2342_v2, 0.0  ;;  %v2106_v19 = vrot.slane %v2105_v11, 4  ;;  %v2120_v20 = vrot.slane %v2119_v0, 4 }
 0x1bf   : > { %v2381_v15 = vmax.f32 %v2341_v8, 0.0  ;;  %v2383_v16 = vmax.f32 %v2343_v10, 0.0  ;;  %v2100_v25 = vmax.f32 %v2098_v3, %v2099_v13  ;;  %v2114_v26 = vmax.f32 %v2112_v4, %v2113_v14 }
 0x1c0   : > { %v2455_v23 = vrot.slane %v2380_v12, 7  ;;  %v2490_v24 = vrot.slane %v2382_v5, 7  ;;  %v2107_v28 = vmax.f32 %v2105_v11, %v2106_v19  ;;  %v2121_v29 = vmax.f32 %v2119_v0, %v2120_v20 }
 0x1c1   : > { %v2476_v27 = vrot.slane %v2381_v15, 7  ;;  %v2504_v9 = vrot.slane %v2383_v16, 7  ;;  %v2101_v32 = vrot.slane %v2100_v25, 2  ;;  %v2115_v33 = vrot.slane %v2114_v26, 2 }
 0x1c2   : > { %v2457_v30 = vsel %vm2456_vm3, %v2455_v23, %v2375_v52  ;;  %v2491_v31 = vsel %vm2456_vm3, %v2490_v24, %v2377_v53  ;;  %v2108_v36 = vrot.slane %v2107_v28, 2  ;;  %v2122_v37 = vrot.slane %v2121_v29, 2 }
 0x1c3   : > { %v2477_v34 = vsel %vm2456_vm3, %v2476_v27, %v2376_v58  ;;  %v2505_v35 = vsel %vm2456_vm3, %v2504_v9, %v2378_v59  ;;  %v2102_v38 = vmax.f32 %v2100_v25, %v2101_v32  ;;  %v2116_v39 = vmax.f32 %v2114_v26, %v2115_v33 }
 0x1c4   : > { %v2109_v40 = vmax.f32 %v2107_v28, %v2108_v36  ;;  %v2123_v41 = vmax.f32 %v2121_v29, %v2122_v37 }
 0x1c5   : > { %v1769_v43 = vpop.f32.mrb[12].mxu0  ;;  %v1882_v44 = vpop.f32.mrb[12].mxu1  ;;  %v2103_v45 = vrot.slane %v2102_v38, 1  ;;  %v2117_v46 = vrot.slane %v2116_v39, 1 }
 0x1c6   : > { %v1771_v47 = vpop.f32.mrb[13].mxu0  ;;  %v1884_v48 = vpop.f32.mrb[13].mxu1  ;;  %v2110_v50 = vrot.slane %v2109_v40, 1  ;;  %v2124_v51 = vrot.slane %v2123_v41, 1 }
 0x1c7   : > { %v1773_v52 = vpop.f32.mrb[14].mxu0  ;;  %v1886_v53 = vpop.f32.mrb[14].mxu1  ;;  %v2104_v54 = vmax.f32 %v2102_v38, %v2103_v45  ;;  %v2118_v55 = vmax.f32 %v2116_v39, %v2117_v46 }
 0x1c8   : > { %v2133_v56 = vmax.f32 %v1769_v43, %v1773_v52  ;;  %v2147_v57 = vmax.f32 %v1882_v44, %v1886_v53  ;;  %v1775_v58 = vpop.f32.mrb[15].mxu0  ;;  %v1888_v59 = vpop.f32.mrb[15].mxu1  ;;  %v2111_v60 = vmax.f32 %v2109_v40, %v2110_v50  ;;  %v2125_v61 = vmax.f32 %v2123_v41, %v2124_v51 }
 0x1c9   : > { %v2140_v62 = vmax.f32 %v1771_v47, %v1775_v58  ;;  %v2154_v63 = vmax.f32 %v1884_v48, %v1888_v59  ;;  %v2345_v1 = vadd.f32 %v3656_v17, %v2104_v54  ;;  %v2347_v2 = vadd.f32 %v3659_v18, %v2118_v55 }
 0x1ca   : > { %v2134_v3 = vrot.slane %v2133_v56, 4  ;;  %v2148_v4 = vrot.slane %v2147_v57, 4  ;;  %v2346_v6 = vadd.f32 %v3662_v21, %v2111_v60  ;;  %v2348_v7 = vadd.f32 %v3665_v22, %v2125_v61 }
 0x1cb   : > { %v2141_v8 = vrot.slane %v2140_v62, 4  ;;  %v2155_v10 = vrot.slane %v2154_v63, 4  ;;  %v2385_v11 = vmax.f32 %v2345_v1, 0.0  ;;  %v2387_v0 = vmax.f32 %v2347_v2, 0.0 }
 0x1cc   : > { %v2135_v12 = vmax.f32 %v2133_v56, %v2134_v3  ;;  %v2149_v5 = vmax.f32 %v2147_v57, %v2148_v4  ;;  %v2386_v13 = vmax.f32 %v2346_v6, 0.0  ;;  %v2388_v14 = vmax.f32 %v2348_v7, 0.0 }
 0x1cd   : > { %v2142_v15 = vmax.f32 %v2140_v62, %v2141_v8  ;;  %v2156_v16 = vmax.f32 %v2154_v63, %v2155_v10  ;;  %v2458_v19 = vrot.slane %v2385_v11, 6  ;;  %v2492_v20 = vrot.slane %v2387_v0, 6 }
 0x1ce   : > { %v2136_v23 = vrot.slane %v2135_v12, 2  ;;  %v2150_v24 = vrot.slane %v2149_v5, 2  ;;  %v2478_v25 = vrot.slane %v2386_v13, 6  ;;  %v2506_v26 = vrot.slane %v2388_v14, 6 }
 0x1cf   : > { %v2143_v27 = vrot.slane %v2142_v15, 2  ;;  %v2157_v9 = vrot.slane %v2156_v16, 2  ;;  %v2460_v28 = vsel %vm2459_vm4, %v2458_v19, %v2457_v30  ;;  %v2493_v29 = vsel %vm2459_vm4, %v2492_v20, %v2491_v31 }
 0x1d0   : > { %v2137_v32 = vmax.f32 %v2135_v12, %v2136_v23  ;;  %v2151_v33 = vmax.f32 %v2149_v5, %v2150_v24  ;;  %v2479_v36 = vsel %vm2459_vm4, %v2478_v25, %v2477_v34  ;;  %v2507_v37 = vsel %vm2459_vm4, %v2506_v26, %v2505_v35 }
 0x1d1   : > { %v2144_v38 = vmax.f32 %v2142_v15, %v2143_v27  ;;  %v2158_v39 = vmax.f32 %v2156_v16, %v2157_v9 }
 0x1d2   : > { %v2138_v40 = vrot.slane %v2137_v32, 1  ;;  %v2152_v41 = vrot.slane %v2151_v33, 1  ;;  %v1779_v43 = vpop.f32.mrb[16].mxu0  ;;  %v1892_v44 = vpop.f32.mrb[16].mxu1 }
 0x1d3   : > { %v2145_v45 = vrot.slane %v2144_v38, 1  ;;  %v2159_v46 = vrot.slane %v2158_v39, 1  ;;  %v1781_v47 = vpop.f32.mrb[17].mxu0  ;;  %v1894_v48 = vpop.f32.mrb[17].mxu1 }
 0x1d4   : > { %v2139_v50 = vmax.f32 %v2137_v32, %v2138_v40  ;;  %v2153_v30 = vmax.f32 %v2151_v33, %v2152_v41  ;;  %v1783_v31 = vpop.f32.mrb[18].mxu0  ;;  %v1896_v51 = vpop.f32.mrb[18].mxu1 }
 0x1d5   : > { %v2146_v52 = vmax.f32 %v2144_v38, %v2145_v45  ;;  %v2160_v53 = vmax.f32 %v2158_v39, %v2159_v46  ;;  %v2168_v34 = vmax.f32 %v1779_v43, %v1783_v31  ;;  %v2182_v54 = vmax.f32 %v1892_v44, %v1896_v51  ;;  %v1785_v35 = vpop.f32.mrb[19].mxu0  ;;  %v1898_v55 = vpop.f32.mrb[19].mxu1 }
 0x1d6   : > { %v2350_v56 = vadd.f32 %v3656_v17, %v2139_v50  ;;  %v2352_v57 = vadd.f32 %v3659_v18, %v2153_v30  ;;  %v2175_v58 = vmax.f32 %v1781_v47, %v1785_v35  ;;  %v2189_v59 = vmax.f32 %v1894_v48, %v1898_v55 }
 0x1d7   : > { %v2351_v60 = vadd.f32 %v3662_v21, %v2146_v52  ;;  %v2353_v61 = vadd.f32 %v3665_v22, %v2160_v53  ;;  %v2169_v62 = vrot.slane %v2168_v34, 4  ;;  %v2183_v63 = vrot.slane %v2182_v54, 4 }
 0x1d8   : > { %v2390_v1 = vmax.f32 %v2350_v56, 0.0  ;;  %v2392_v2 = vmax.f32 %v2352_v57, 0.0  ;;  %v2176_v3 = vrot.slane %v2175_v58, 4  ;;  %v2190_v4 = vrot.slane %v2189_v59, 4 }
 0x1d9   : > { %v2391_v6 = vmax.f32 %v2351_v60, 0.0  ;;  %v2393_v7 = vmax.f32 %v2353_v61, 0.0  ;;  %v2170_v8 = vmax.f32 %v2168_v34, %v2169_v62  ;;  %v2184_v10 = vmax.f32 %v2182_v54, %v2183_v63 }
 0x1da   : > { %v2461_v11 = vrot.slane %v2390_v1, 5  ;;  %v2494_v0 = vrot.slane %v2392_v2, 5  ;;  %v2177_v12 = vmax.f32 %v2175_v58, %v2176_v3  ;;  %v2191_v5 = vmax.f32 %v2189_v59, %v2190_v4 }
 0x1db   : > { %v2480_v13 = vrot.slane %v2391_v6, 5  ;;  %v2508_v14 = vrot.slane %v2393_v7, 5  ;;  %v2171_v15 = vrot.slane %v2170_v8, 2  ;;  %v2185_v16 = vrot.slane %v2184_v10, 2 }
 0x1dc   : > { %v2463_v19 = vsel %vm2462_vm5, %v2461_v11, %v2460_v28  ;;  %v2495_v20 = vsel %vm2462_vm5, %v2494_v0, %v2493_v29  ;;  %v2178_v23 = vrot.slane %v2177_v12, 2  ;;  %v2192_v24 = vrot.slane %v2191_v5, 2 }
 0x1dd   : > { %v2481_v25 = vsel %vm2462_vm5, %v2480_v13, %v2479_v36  ;;  %v2509_v26 = vsel %vm2462_vm5, %v2508_v14, %v2507_v37  ;;  %v2172_v27 = vmax.f32 %v2170_v8, %v2171_v15  ;;  %v2186_v9 = vmax.f32 %v2184_v10, %v2185_v16 }
 0x1de   : > { %v2179_v32 = vmax.f32 %v2177_v12, %v2178_v23  ;;  %v2193_v33 = vmax.f32 %v2191_v5, %v2192_v24  ;;  %v1789_v38 = vpop.f32.mrb[20].mxu0  ;;  %v1902_v39 = vpop.f32.mrb[20].mxu1 }
 0x1df   : > { %v2173_v40 = vrot.slane %v2172_v27, 1  ;;  %v2187_v41 = vrot.slane %v2186_v9, 1  ;;  %v1791_v43 = vpop.f32.mrb[21].mxu0  ;;  %v1904_v44 = vpop.f32.mrb[21].mxu1 }
 0x1e0   : > { %v2180_v28 = vrot.slane %v2179_v32, 1  ;;  %v2194_v45 = vrot.slane %v2193_v33, 1  ;;  %v1793_v29 = vpop.f32.mrb[22].mxu0  ;;  %v1906_v46 = vpop.f32.mrb[22].mxu1 }
 0x1e1   : > { %v2174_v47 = vmax.f32 %v2172_v27, %v2173_v40  ;;  %v2188_v48 = vmax.f32 %v2186_v9, %v2187_v41  ;;  %v2203_v36 = vmax.f32 %v1789_v38, %v1793_v29  ;;  %v2217_v50 = vmax.f32 %v1902_v39, %v1906_v46  ;;  %v1795_v37 = vpop.f32.mrb[23].mxu0  ;;  %v1908_v30 = vpop.f32.mrb[23].mxu1 }
 0x1e2   : > { %v2181_v31 = vmax.f32 %v2179_v32, %v2180_v28  ;;  %v2195_v51 = vmax.f32 %v2193_v33, %v2194_v45  ;;  %v2210_v52 = vmax.f32 %v1791_v43, %v1795_v37  ;;  %v2224_v53 = vmax.f32 %v1904_v44, %v1908_v30 }
 0x1e3   : > { %v2355_v34 = vadd.f32 %v3656_v17, %v2174_v47  ;;  %v2357_v54 = vadd.f32 %v3659_v18, %v2188_v48  ;;  %v2204_v35 = vrot.slane %v2203_v36, 4  ;;  %v2218_v55 = vrot.slane %v2217_v50, 4 }
 0x1e4   : > { %v2356_v56 = vadd.f32 %v3662_v21, %v2181_v31  ;;  %v2358_v57 = vadd.f32 %v3665_v22, %v2195_v51  ;;  %v2211_v58 = vrot.slane %v2210_v52, 4  ;;  %v2225_v59 = vrot.slane %v2224_v53, 4 }
 0x1e5   : > { %v2395_v60 = vmax.f32 %v2355_v34, 0.0  ;;  %v2397_v61 = vmax.f32 %v2357_v54, 0.0  ;;  %v2205_v62 = vmax.f32 %v2203_v36, %v2204_v35  ;;  %v2219_v63 = vmax.f32 %v2217_v50, %v2218_v55 }
 0x1e6   : > { %v2396_v1 = vmax.f32 %v2356_v56, 0.0  ;;  %v2398_v2 = vmax.f32 %v2358_v57, 0.0  ;;  %v2212_v3 = vmax.f32 %v2210_v52, %v2211_v58  ;;  %v2226_v4 = vmax.f32 %v2224_v53, %v2225_v59 }
 0x1e7   : > { %v2464_v6 = vrot.slane %v2395_v60, 4  ;;  %v2496_v7 = vrot.slane %v2397_v61, 4  ;;  %v2206_v8 = vrot.slane %v2205_v62, 2  ;;  %v2220_v10 = vrot.slane %v2219_v63, 2 }
 0x1e8   : > { %v2482_v11 = vrot.slane %v2396_v1, 4  ;;  %v2510_v0 = vrot.slane %v2398_v2, 4  ;;  %v2213_v12 = vrot.slane %v2212_v3, 2  ;;  %v2227_v5 = vrot.slane %v2226_v4, 2 }
 0x1e9   : > { %v2466_v13 = vsel %vm2465_vm6, %v2464_v6, %v2463_v19  ;;  %v2497_v14 = vsel %vm2465_vm6, %v2496_v7, %v2495_v20  ;;  %v2207_v15 = vmax.f32 %v2205_v62, %v2206_v8  ;;  %v2221_v16 = vmax.f32 %v2219_v63, %v2220_v10 }
 0x1ea   : > { %v2483_v23 = vsel %vm2465_vm6, %v2482_v11, %v2481_v25  ;;  %v2511_v24 = vsel %vm2465_vm6, %v2510_v0, %v2509_v26  ;;  %v2214_v27 = vmax.f32 %v2212_v3, %v2213_v12  ;;  %v2228_v9 = vmax.f32 %v2226_v4, %v2227_v5 }
 0x1eb   : > { %v2208_v32 = vrot.slane %v2207_v15, 1  ;;  %v2222_v33 = vrot.slane %v2221_v16, 1 }
 0x1ec   : > { %v2215_v38 = vrot.slane %v2214_v27, 1  ;;  %v2229_v39 = vrot.slane %v2228_v9, 1  ;;  %v1799_v40 = vpop.f32.mrb[24].mxu0  ;;  %v1912_v41 = vpop.f32.mrb[24].mxu1 }
 0x1ed   : > { %v2209_v43 = vmax.f32 %v2207_v15, %v2208_v32  ;;  %v2223_v44 = vmax.f32 %v2221_v16, %v2222_v33  ;;  %v1801_v28 = vpop.f32.mrb[25].mxu0  ;;  %v1914_v19 = vpop.f32.mrb[25].mxu1 }
 0x1ee   : > { %v2216_v20 = vmax.f32 %v2214_v27, %v2215_v38  ;;  %v2230_v45 = vmax.f32 %v2228_v9, %v2229_v39  ;;  %v1803_v29 = vpop.f32.mrb[26].mxu0  ;;  %v1916_v46 = vpop.f32.mrb[26].mxu1 }
 0x1ef   : > { %v2360_v25 = vadd.f32 %v3656_v17, %v2209_v43  ;;  %v2362_v26 = vadd.f32 %v3659_v18, %v2223_v44  ;;  %v2238_v47 = vmax.f32 %v1799_v40, %v1803_v29  ;;  %v2252_v48 = vmax.f32 %v1912_v41, %v1916_v46  ;;  %v1805_v36 = vpop.f32.mrb[27].mxu0  ;;  %v1918_v50 = vpop.f32.mrb[27].mxu1 }
 0x1f0   : > { %v2361_v37 = vadd.f32 %v3662_v21, %v2216_v20  ;;  %v2363_v30 = vadd.f32 %v3665_v22, %v2230_v45  ;;  %v2245_v31 = vmax.f32 %v1801_v28, %v1805_v36  ;;  %v2259_v51 = vmax.f32 %v1914_v19, %v1918_v50 }
 0x1f1   : > { %v2400_v52 = vmax.f32 %v2360_v25, 0.0  ;;  %v2402_v53 = vmax.f32 %v2362_v26, 0.0  ;;  %v2239_v34 = vrot.slane %v2238_v47, 4  ;;  %v2253_v54 = vrot.slane %v2252_v48, 4 }
 0x1f2   : > { %v2401_v35 = vmax.f32 %v2361_v37, 0.0  ;;  %v2403_v55 = vmax.f32 %v2363_v30, 0.0  ;;  %v2246_v56 = vrot.slane %v2245_v31, 4  ;;  %v2260_v57 = vrot.slane %v2259_v51, 4 }
 0x1f3   : > { %v2467_v58 = vrot.slane %v2400_v52, 3  ;;  %v2498_v59 = vrot.slane %v2402_v53, 3  ;;  %v2240_v60 = vmax.f32 %v2238_v47, %v2239_v34  ;;  %v2254_v61 = vmax.f32 %v2252_v48, %v2253_v54 }
 0x1f4   : > { %v2484_v62 = vrot.slane %v2401_v35, 3  ;;  %v2512_v63 = vrot.slane %v2403_v55, 3  ;;  %v2247_v1 = vmax.f32 %v2245_v31, %v2246_v56  ;;  %v2261_v2 = vmax.f32 %v2259_v51, %v2260_v57 }
 0x1f5   : > { %v3708_v3 = vsel %vm2468_vm7, %v2467_v58, %v2466_v13  ;;  %v3711_v4 = vsel %vm2468_vm7, %v2498_v59, %v2497_v14  ;;  %v2241_v6 = vrot.slane %v2240_v60, 2  ;;  %v2255_v7 = vrot.slane %v2254_v61, 2 }
 0x1f6   : > { %v3714_v8 = vsel %vm2468_vm7, %v2484_v62, %v2483_v23  ;;  %v3717_v10 = vsel %vm2468_vm7, %v2512_v63, %v2511_v24  ;;  %v2248_v11 = vrot.slane %v2247_v1, 2  ;;  %v2262_v0 = vrot.slane %v2261_v2, 2 }
 0x1f7   : > { %v2242_v12 = vmax.f32 %v2240_v60, %v2241_v6  ;;  %v2256_v5 = vmax.f32 %v2254_v61, %v2255_v7 }
 0x1f8   : > { %v2249_v15 = vmax.f32 %v2247_v1, %v2248_v11  ;;  %v2263_v16 = vmax.f32 %v2261_v2, %v2262_v0 }
 0x1f9   : > { %v2243_v9 = vrot.slane %v2242_v12, 1  ;;  %v2257_v32 = vrot.slane %v2256_v5, 1 }
 0x1fa   : > { %v1809_v27 = vpop.f32.mrb[28].mxu0  ;;  %v1922_v13 = vpop.f32.mrb[28].mxu1  ;;  %v2250_v38 = vrot.slane %v2249_v15, 1  ;;  %v2264_v39 = vrot.slane %v2263_v16, 1 }
 0x1fb   : > { %v1811_v14 = vpop.f32.mrb[29].mxu0  ;;  %v1924_v33 = vpop.f32.mrb[29].mxu1  ;;  %v2244_v41 = vmax.f32 %v2242_v12, %v2243_v9  ;;  %v2258_v24 = vmax.f32 %v2256_v5, %v2257_v32 }
 0x1fc   : > { %v1813_v23 = vpop.f32.mrb[30].mxu0  ;;  %v1926_v40 = vpop.f32.mrb[30].mxu1  ;;  %v2251_v20 = vmax.f32 %v2249_v15, %v2250_v38  ;;  %v2265_v45 = vmax.f32 %v2263_v16, %v2264_v39 }
 0x1fd   : > { %v2273_v43 = vmax.f32 %v1809_v27, %v1813_v23  ;;  %v2287_v44 = vmax.f32 %v1922_v13, %v1926_v40  ;;  %v1815_v28 = vpop.f32.mrb[31].mxu0  ;;  %v1928_v19 = vpop.f32.mrb[31].mxu1  ;;  %v2365_v25 = vadd.f32 %v3656_v17, %v2244_v41  ;;  %v2367_v26 = vadd.f32 %v3659_v18, %v2258_v24 }
 0x1fe   : > { %v2280_v29 = vmax.f32 %v1811_v14, %v1815_v28  ;;  %v2294_v46 = vmax.f32 %v1924_v33, %v1928_v19  ;;  %v2366_v36 = vadd.f32 %v3662_v21, %v2251_v20  ;;  %v2368_v50 = vadd.f32 %v3665_v22, %v2265_v45 }
 0x1ff   : > { %v2274_v47 = vrot.slane %v2273_v43, 4  ;;  %v2288_v48 = vrot.slane %v2287_v44, 4  ;;  %v2405_v31 = vmax.f32 %v2365_v25, 0.0  ;;  %v2407_v51 = vmax.f32 %v2367_v26, 0.0 }
 0x200   : > { %v2281_v37 = vrot.slane %v2280_v29, 4  ;;  %v2295_v30 = vrot.slane %v2294_v46, 4  ;;  %v2406_v34 = vmax.f32 %v2366_v36, 0.0  ;;  %v2408_v54 = vmax.f32 %v2368_v50, 0.0 }
 0x201   : > { %v2275_v52 = vmax.f32 %v2273_v43, %v2274_v47  ;;  %v2289_v53 = vmax.f32 %v2287_v44, %v2288_v48  ;;  %v2470_v58 = vrot.slane %v2405_v31, 2  ;;  %v2500_v59 = vrot.slane %v2407_v51, 2 }
 0x202   : > { %v2282_v35 = vmax.f32 %v2280_v29, %v2281_v37  ;;  %v2296_v55 = vmax.f32 %v2294_v46, %v2295_v30  ;;  %v1965_v56 = vpop.f32.mrb[32].mxu0  ;;  %v1997_v57 = vpop.f32.mrb[32].mxu1  ;;  %v2486_v1 = vrot.slane %v2406_v34, 2  ;;  %v2514_v2 = vrot.slane %v2408_v54, 2 }
 0x203   : > { %v2276_v60 = vrot.slane %v2275_v52, 2  ;;  %v2290_v61 = vrot.slane %v2289_v53, 2  ;;  %v1967_v62 = vpop.f32.mrb[33].mxu0  ;;  %v1999_v63 = vpop.f32.mrb[33].mxu1  ;;  %v2472_v12 = vsel %vm2471_vm8, %v2470_v58, %v3708_v3  ;;  %v2501_v5 = vsel %vm2471_vm8, %v2500_v59, %v3711_v4 }
 0x204   : > { %v2283_v6 = vrot.slane %v2282_v35, 2  ;;  %v2297_v7 = vrot.slane %v2296_v55, 2  ;;  %v1968_v11 = vpop.f32.mrb[34].mxu0  ;;  %v2000_v0 = vpop.f32.mrb[34].mxu1  ;;  %v2487_v9 = vsel %vm2471_vm8, %v2486_v1, %v3714_v8  ;;  %v2515_v32 = vsel %vm2471_vm8, %v2514_v2, %v3717_v10 }
 0x205   : > { %v2277_v15 = vmax.f32 %v2275_v52, %v2276_v60  ;;  %v2291_v16 = vmax.f32 %v2289_v53, %v2290_v61  ;;  %v1970_v27 = vpop.f32.mrb[35].mxu0  ;;  %v2002_v13 = vpop.f32.mrb[35].mxu1  ;;  %v2056_v23 = vmax.f32 %v1965_v56, %v1968_v11  ;;  %v2196_v3 = vmax.f32 %v1997_v57, %v2000_v0 }
 0x206   : > { %v2284_v14 = vmax.f32 %v2282_v35, %v2283_v6  ;;  %v2298_v33 = vmax.f32 %v2296_v55, %v2297_v7  ;;  %v2328_v7 = vsub.s32 4, %v3644_v49 }
 0x207   : > { %v2278_v38 = vrot.slane %v2277_v15, 1  ;;  %v2292_v39 = vrot.slane %v2291_v16, 1  ;;  %v2057_v43 = vrot.slane %v2056_v23, 4  ;;  %v2197_v54 = vrot.slane %v2196_v3, 4 }
 0x208   : > { %v2285_v40 = vrot.slane %v2284_v14, 1  ;;  %v2299_v4 = vrot.slane %v2298_v33, 1 }
 0x209   : > { %v2279_v41 = vmax.f32 %v2277_v15, %v2278_v38  ;;  %v2293_v24 = vmax.f32 %v2291_v16, %v2292_v39  ;;  %v2058_v45 = vmax.f32 %v2056_v23, %v2057_v43  ;;  %v2198_v11 = vmax.f32 %v2196_v3, %v2197_v54 }
 0x20a   : > { %v2286_v44 = vmax.f32 %v2284_v14, %v2285_v40  ;;  %v2300_v28 = vmax.f32 %v2298_v33, %v2299_v4  ;;  %v1973_v19 = vpop.f32.mrb[36].mxu0  ;;  %v2005_v8 = vpop.f32.mrb[36].mxu1  ;;  %v2329_v39 = vrot.slane %v3651_v42, %v2328_v7 }
 0x20b   : > { %v2370_v10 = vadd.f32 %v3656_v17, %v2279_v41  ;;  %v2372_v20 = vadd.f32 %v3659_v18, %v2293_v24  ;;  %v1975_v29 = vpop.f32.mrb[37].mxu0  ;;  %v2007_v46 = vpop.f32.mrb[37].mxu1  ;;  %v2059_v37 = vrot.slane %v2058_v45, 2  ;;  %v2199_v23 = vrot.slane %v2198_v11, 2 }
 0x20c   : > { %v2371_v25 = vadd.f32 %v3662_v21, %v2286_v44  ;;  %v2373_v26 = vadd.f32 %v3665_v22, %v2300_v28  ;;  %v1976_v47 = vpop.f32.mrb[38].mxu0  ;;  %v2008_v48 = vpop.f32.mrb[38].mxu1 }
 0x20d   : > { %v2410_v36 = vmax.f32 %v2370_v10, 0.0  ;;  %v2412_v50 = vmax.f32 %v2372_v20, 0.0  ;;  %v1978_v30 = vpop.f32.mrb[39].mxu0  ;;  %v2010_v31 = vpop.f32.mrb[39].mxu1  ;;  %v2091_v17 = vmax.f32 %v1973_v19, %v1976_v47  ;;  %v2231_v53 = vmax.f32 %v2005_v8, %v2008_v48 }
 0x20e   : > { %v2411_v51 = vmax.f32 %v2371_v25, 0.0  ;;  %v2413_v52 = vmax.f32 %v2373_v26, 0.0  ;;  %v2060_v21 = vmax.f32 %v2058_v45, %v2059_v37  ;;  %v2200_v20 = vmax.f32 %v2198_v11, %v2199_v23 }
 0x20f   : > { %v2473_v18 = vrot.slane %v2410_v36, 1  ;;  %v2502_v34 = vrot.slane %v2412_v50, 1  ;;  %v2092_v56 = vrot.slane %v2091_v17, 4  ;;  %v2232_v58 = vrot.slane %v2231_v53, 4 }
 0x210   : > { %v2488_v35 = vrot.slane %v2411_v51, 1  ;;  %v2516_v55 = vrot.slane %v2413_v52, 1  ;;  %v2061_v6 = vrot.slane %v2060_v21, 1 }
 0x211   : > { %v2475_v22 = vsel %vm2474_vm9, %v2473_v18, %v2472_v12  ;;  %v2503_v57 = vsel %vm2474_vm9, %v2502_v34, %v2501_v5  ;;  %v2093_v61 = vmax.f32 %v2091_v17, %v2092_v56  ;;  %v2233_v15 = vmax.f32 %v2231_v53, %v2232_v58 }
 0x212   : > { %2537 = vst [vmem:[%s3740_s8] sm:$0xff] %v2475_v22  ;;  %2539 = vst [vmem:[%s3740_s8 + $0x10] sm:$0xff] %v2503_v57  ;;  %v2489_v59 = vsel %vm2474_vm9, %v2488_v35, %v2487_v9  ;;  %v2517_v60 = vsel %vm2474_vm9, %v2516_v55, %v2515_v32  ;;  %v1981_v62 = vpop.f32.mrb[40].mxu0  ;;  %v2013_v63 = vpop.f32.mrb[40].mxu1  ;;  %v2062_v38 = vmax.f32 %v2060_v21, %v2061_v6  ;;  %v2201_v17 = vrot.slane %v2200_v20, 1 }
 0x213   : > { %2538 = vst [vmem:[%s3740_s8 + $0x8] sm:$0xff] %v2489_v59  ;;  %2540 = vst [vmem:[%s3740_s8 + $0x18] sm:$0xff] %v2517_v60  ;;  %v1983_v1 = vpop.f32.mrb[41].mxu0  ;;  %v2015_v2 = vpop.f32.mrb[41].mxu1  ;;  %v2094_v0 = vrot.slane %v2093_v61, 2  ;;  %v2234_v4 = vrot.slane %v2233_v15, 2 }
 0x214   : > { %v1984_v12 = vpop.f32.mrb[42].mxu0  ;;  %v2016_v5 = vpop.f32.mrb[42].mxu1  ;;  %v2339_v10 = vadd.f32 %v2329_v39, %v2062_v38  ;;  %v2202_v58 = vmax.f32 %v2200_v20, %v2201_v17 }
 0x215   : > { %v2126_v16 = vmax.f32 %v1981_v62, %v1984_v12  ;;  %v2266_v27 = vmax.f32 %v2013_v63, %v2016_v5  ;;  %v1986_v13 = vpop.f32.mrb[43].mxu0  ;;  %v2018_v9 = vpop.f32.mrb[43].mxu1  ;;  %v2095_v32 = vmax.f32 %v2093_v61, %v2094_v0  ;;  %v2235_v25 = vmax.f32 %v2233_v15, %v2234_v4 }
 0x216   : > { %v2379_v52 = vmax.f32 %v2339_v10, 0.0  ;;  %v2359_v7 = vadd.f32 %v2329_v39, %v2202_v58 }
 0x217   : > { %v2127_v14 = vrot.slane %v2126_v16, 4  ;;  %v2267_v33 = vrot.slane %v2266_v27, 4  ;;  %v2096_v40 = vrot.slane %v2095_v32, 1  ;;  %v2236_v18 = vrot.slane %v2235_v25, 1 }
 0x218   : > { %v2399_v13 = vmax.f32 %v2359_v7, 0.0 }
 0x219   : > { %v2128_v41 = vmax.f32 %v2126_v16, %v2127_v14  ;;  %v2268_v49 = vmax.f32 %v2266_v27, %v2267_v33  ;;  %v2097_v3 = vmax.f32 %v2095_v32, %v2096_v40  ;;  %v2237_v59 = vmax.f32 %v2235_v25, %v2236_v18 }
 0x21a   : > { %v1989_v24 = vpop.f32.mrb[44].mxu0  ;;  %v2021_v43 = vpop.f32.mrb[44].mxu1  ;;  %v2524_v23 = vrot.slane %v2399_v13, 4 }
 0x21b   : > { %v2129_v44 = vrot.slane %v2128_v41, 2  ;;  %v2269_v28 = vrot.slane %v2268_v49, 2  ;;  %v1991_v19 = vpop.f32.mrb[45].mxu0  ;;  %v2023_v8 = vpop.f32.mrb[45].mxu1  ;;  %v2344_v45 = vadd.f32 %v2329_v39, %v2097_v3  ;;  %v2364_v11 = vadd.f32 %v2329_v39, %v2237_v59 }
 0x21c   : > { %v1992_v29 = vpop.f32.mrb[46].mxu0  ;;  %v2024_v46 = vpop.f32.mrb[46].mxu1 }
 0x21d   : > { %v2130_v26 = vmax.f32 %v2128_v41, %v2129_v44  ;;  %v2161_v42 = vmax.f32 %v1989_v24, %v1992_v29  ;;  %v2301_v47 = vmax.f32 %v2021_v43, %v2024_v46  ;;  %v1994_v48 = vpop.f32.mrb[47].mxu0  ;;  %v2026_v36 = vpop.f32.mrb[47].mxu1  ;;  %v2384_v50 = vmax.f32 %v2344_v45, 0.0 }
 0x21e   : > { %v2270_v37 = vmax.f32 %v2268_v49, %v2269_v28  ;;  %v2404_v9 = vmax.f32 %v2364_v11, 0.0 }
 0x21f   : > { %v2131_v30 = vrot.slane %v2130_v26, 1  ;;  %v2162_v31 = vrot.slane %v2161_v42, 4  ;;  %v2302_v51 = vrot.slane %v2301_v47, 4  ;;  %v2518_v53 = vrot.slane %v2384_v50, 7 }
 0x220   : > { %v2271_v21 = vrot.slane %v2270_v37, 1  ;;  %v2526_v40 = vrot.slane %v2404_v9, 3 }
 0x221   : > { %v2132_v34 = vmax.f32 %v2130_v26, %v2131_v30  ;;  %v2163_v54 = vmax.f32 %v2161_v42, %v2162_v31  ;;  %v2303_v35 = vmax.f32 %v2301_v47, %v2302_v51  ;;  %v2519_v55 = vsel %vm2456_vm3, %v2518_v53, %v2379_v52 }
 0x222   : > { %v2272_v63 = vmax.f32 %v2270_v37, %v2271_v21 }
 0x223   : > { %v2349_v56 = vadd.f32 %v2329_v39, %v2132_v34  ;;  %v2164_v22 = vrot.slane %v2163_v54, 2  ;;  %v2304_v57 = vrot.slane %v2303_v35, 2 }
 0x224   : > { %v2369_v15 = vadd.f32 %v2329_v39, %v2272_v63 }
 0x225   : > { %v2389_v60 = vmax.f32 %v2349_v56, 0.0  ;;  %v2165_v61 = vmax.f32 %v2163_v54, %v2164_v22  ;;  %v2305_v62 = vmax.f32 %v2303_v35, %v2304_v57 }
 0x226   : > { %v2409_v14 = vmax.f32 %v2369_v15, 0.0 }
 0x227   : > { %v2520_v1 = vrot.slane %v2389_v60, 6  ;;  %v2166_v2 = vrot.slane %v2165_v61, 1  ;;  %v2306_v6 = vrot.slane %v2305_v62, 1 }
 0x228   : > { %v2528_v41 = vrot.slane %v2409_v14, 2 }
 0x229   : > { %v2521_v0 = vsel %vm2459_vm4, %v2520_v1, %v2519_v55  ;;  %v2167_v12 = vmax.f32 %v2165_v61, %v2166_v2  ;;  %v2307_v5 = vmax.f32 %v2305_v62, %v2306_v6 }
 0x22b   : > { %v2354_v16 = vadd.f32 %v2329_v39, %v2167_v12  ;;  %v2374_v27 = vadd.f32 %v2329_v39, %v2307_v5 }
 0x22d   : > { %v2394_v32 = vmax.f32 %v2354_v16, 0.0  ;;  %v2414_v38 = vmax.f32 %v2374_v27, 0.0 }
 0x22f   : > { %v2522_v33 = vrot.slane %v2394_v32, 5  ;;  %v2530_v3 = vrot.slane %v2414_v38, 1 }
 0x231   : > { %v2523_v4 = vsel %vm2462_vm5, %v2522_v33, %v2521_v0 }
 0x232   : > { %v2525_v49 = vsel %vm2465_vm6, %v2524_v23, %v2523_v4 }
 0x233   : > { %v2527_v39 = vsel %vm2468_vm7, %v2526_v40, %v2525_v49 }
 0x234   : > { %v2529_v24 = vsel %vm2471_vm8, %v2528_v41, %v2527_v39 }
 0x235   : > { %v2531_v43 = vsel %vm2474_vm9, %v2530_v3, %v2529_v24 }
 0x236   : > { %2541 = vst [vmem:[%s3740_s8 + $0x20] sm:$0xff] %v2531_v43 }
 0x237   : > { %3038 = shalt.err (!%p3035_p7)
}
 0x238   : > { %s3039_s27 = scalar_lea.hbm %s3761_s19, 640  ;;  %s3043_s30 = scalar_lea.hbm %s3810_s3, 1280 }
 0x239   : > { %p3040_p8 = scmp.ne.s32.totalorder %s3761_s19, %s3039_s27  ;;  %p3044_p1 = scmp.lt.u32.totalorder %s3761_s19, %s3810_s3 }
 0x23a   : > { %p3045_p0 = scmp.lt.u32.totalorder %s3043_s30, %s3039_s27  ;;  %p3047_p6 = scmp.lt.u32.totalorder %s3039_s27, %s3761_s19 }
 0x23b   : > { %p3041_p11 = pnand %p3040_p8, %p3829_p9 }
 0x23c   : > { %p3046_p5 = por %p3045_p0, %p3044_p1 }
 0x23d   : > { %p3042_p13 = pneg %p3041_p11 }
 0x23e   : > { %p3048_p10 = por %p3047_p6, %p3046_p5 }
 0x240   : > { %p3049_p12 = pnand %p3048_p10, %p3042_p13 }
 0x242   : > { %3052 = shalt.err (!%p3049_p12)
}
 0x243   : > { %2831 = dma.vmem_to_hbm [thread:$0]  (%p3829_p9), %s3763_s10, 640, %s3761_s19, %s2543_s16  }
 0x244 PF: > { %p2843_p2 = scmp.ge.s32.totalorder %s3091_s15, 2  ;;  %s2569_s6 = sand.u32 1, %s3079_s12  }
 0x245   : > { %p3830_p3 = scmp.ne.s32.totalorder %s3815_s23, 0  ;;  %s2570_s7 = scalar_lea.sflag [#allocation6], %s2569_s6 }
 0x247   : > { %p2838_p4 = pnand %p2843_p2, %p3830_p3 }
 0x249   : > { %3074 = dma.done.wait (!%p2838_p4), %s2570_s7, 640  }
 0x24a   : > { %3076 = vsyncadd (!%p2838_p4), %s2570_s7, 4294966656  ;;  %p14_p7 = scmp.ge.s32.totalorder %s3147_s18, 4   ;;  %s3831_s12 = smov %s3083_s13 }
 0x24b   : > { %s3832_s13 = smov %s3087_s14  ;;  %s3833_s14 = smov %s3158_s21 }
 0x24c   : > { %s3834_s15 = smov %s3147_s18  ;;  %16 = sbr.rel (!%p14_p7) target bundleno = 4 (0x4), region = 72 }
 0x253   :  { %2575 = vsyncpa [#allocation5], 1 }
 0x254   :  { %2577 = vsyncpa [#allocation5 + $0x1], 1 }
 0x255   :  { %2578 = vsyncpa [#allocation6], 1 }
 0x256   :  { %2580 = vsyncpa [#allocation6 + $0x1], 1 }

</bundles_post_ra>
